<compile_context>
chip_gen: v7x
topology: tpu7x:2x2x1
jax: 0.10.0
libtpu: 0.0.40
codegen_flags: <defaults>
</compile_context>

<pallas_src>
import numpy as np
import jax
import jax.numpy as jnp
from jax.experimental import pallas as pl
from jax.experimental.pallas import tpu as pltpu


def _round_up(x, m):
    return ((x + m - 1) // m) * m


def _interp_matrix(n_in, n_out):
    """Row-interpolation matrix for bilinear upsampling with align_corners=True."""
    a = np.zeros((n_out, n_in), dtype=np.float32)
    if n_in == 1 or n_out == 1:
        a[:, 0] = 1.0
        return a
    scale = (n_in - 1) / (n_out - 1)
    for i in range(n_out):
        s = i * scale
        lo = int(np.floor(s))
        hi = min(lo + 1, n_in - 1)
        f = s - lo
        a[i, lo] += 1.0 - f
        a[i, hi] += f
    return a


def _upsample_pad_flatten_matrix(H1, W1, H2, W2, Wp, la):
    """(H1*W1, la) matrix folding: bilinear 2x upsample (align_corners=True),
    F.pad to (H2, W2), conv zero-pad(1), and row-major flatten into the
    padded-flat lane layout.  Batch/channel independent (linear in spatial
    size per row; replaces the old kron(eye(N*C), ah) constant)."""
    Ho, Wo = 2 * H1, 2 * W1
    dY, dX = H2 - Ho, W2 - Wo
    assert dY >= 0 and dX >= 0, "x2 spatial must be >= upsampled x1 spatial"
    padT, padL = dY // 2, dX // 2
    ah = _interp_matrix(H1, Ho)          # (Ho, H1)
    aw = _interp_matrix(W1, Wo)          # (Wo, W1)
    m = np.zeros((H1 * W1, la), dtype=np.float32)
    for i in range(Ho):
        row = 1 + padT + i               # row inside the conv-padded image
        for j in range(Wo):
            col = 1 + padL + j
            m[:, row * Wp + col] = np.outer(ah[i], aw[j]).reshape(-1)
    return m


def _fold_bn(w, b, bn, eps=1e-5):
    """Fold eval-mode BatchNorm2d into conv weight/bias."""
    gamma, beta, mean, var = bn
    inv = gamma / jnp.sqrt(var + eps)
    return w * inv[:, None, None, None], (b - mean) * inv + beta


# --------------------------------------------------------------------------
# Fused Up kernel: upsample -> pad -> concat -> (conv3x3 + BN + ReLU) x 2
# --------------------------------------------------------------------------
def up_fused(x1, x2, w1, b1, w2, b2):
    """x1: (N, C1, H1, W1) (to be upsampled), x2: (N, C2, H2, W2) (skip).
    w1: (Cmid, C2+C1, 3, 3), w2: (Cout, Cmid, 3, 3); biases have BN folded."""
    N, C1, H1, W1 = x1.shape
    N2, C2, H2, W2 = x2.shape
    assert N == N2
    Cin = C1 + C2
    Cmid = w1.shape[0]
    Cout = w2.shape[0]
    assert w1.shape == (Cmid, Cin, 3, 3) and w2.shape == (Cout, Cmid, 3, 3)

    Hp, Wp = H2 + 2, W2 + 2              # conv zero-pad of 1 around x2 spatial
    P = Hp * Wp                          # padded flat size per channel
    LA = _round_up(P, 128)               # lane-dense compute width per batch
    TAIL = _round_up(2 * Wp + 2, 128)    # slack so 3x3 tap slices never run off
    HEAD = 128                           # aligned head pad of the mid buffer
    # Static safety checks (out-of-segment tap reads must hit zeroed lanes).
    assert HEAD >= Wp + 1, "image too wide for the fixed 128-lane head pad"
    assert TAIL >= 2 * Wp + 2
    base2 = HEAD - (Wp + 1)              # conv2 tap base offset in mid buffer

    # ---- trace-time constants (tiny, batch/channel independent) ----
    m_up = jnp.asarray(_upsample_pad_flatten_matrix(H1, W1, H2, W2, Wp, LA))
    loc = np.arange(LA)
    mask = jnp.asarray(((loc % Wp < W2) & (loc < H2 * Wp))
                       .astype(np.float32).reshape(1, LA))

    # ---- cheap wrapper-side prep (no full-activation transpose/packing) ----
    x1f = x1.reshape(N, C1, H1 * W1)                            # free reshape
    x2f = jnp.pad(x2, ((0, 0), (0, 0), (1, 1), (1, 1)))         # conv padding
    x2f = x2f.reshape(N, C2, P)
    x2f = jnp.pad(x2f, ((0, 0), (0, 0), (0, LA + TAIL - P)))    # (N,C2,LA+TAIL)

    # Weights stacked so each conv is ONE matmul over a (9*C, LA) tap stack:
    # row t*C + c of the stack holds channel c shifted by tap t = dy*3 + dx.
    w1s = jnp.transpose(w1, (0, 2, 3, 1)).reshape(Cmid, 9 * Cin)
    w2s = jnp.transpose(w2, (0, 2, 3, 1)).reshape(Cout, 9 * Cmid)
    b1c = b1.reshape(Cmid, 1)
    b2c = b2.reshape(Cout, 1)

    def kernel(mask_ref, x1_ref, mup_ref, x2_ref, w1_ref, b1_ref, w2_ref,
               b2_ref, o_ref, x1u_ref, stk1_ref, mid_ref, stk2_ref):
        # Zero ONLY the regions that are read but never written this step
        # (aligned 128-lane head/tail stripes; the rest is fully overwritten).
        x1u_ref[:, LA:] = jnp.zeros((C1, TAIL), jnp.float32)
        mid_ref[:, :HEAD] = jnp.zeros((Cmid, HEAD), jnp.float32)
        mid_ref[:, HEAD + LA:] = jnp.zeros((Cmid, TAIL), jnp.float32)

        # --- Stage 1: upsample + F.pad + conv-pad + flatten: ONE matmul -----
        # (C1, H1*W1) @ (H1*W1, LA) -> padded-flat, lane-dense, aligned store.
        x1u_ref[:, :LA] = jnp.dot(x1_ref[0], mup_ref[...],
                                  preferred_element_type=jnp.float32)

        # --- Stage 2: conv1 (+folded BN) + ReLU --------------------------
        # Build the (9*Cin, LA) tap stack; the channel concat [x2, x1] is done
        # implicitly by filling rows [0:C2] from x2 and [C2:Cin] from x1u.
        for t in range(9):
            off = (t // 3) * Wp + (t % 3)
            stk1_ref[t * Cin:t * Cin + C2, :] = x2_ref[0, :, off:off + LA]
            stk1_ref[t * Cin + C2:(t + 1) * Cin, :] = x1u_ref[:, off:off + LA]
        h = jnp.dot(w1_ref[...], stk1_ref[...],
                    preferred_element_type=jnp.float32) + b1_ref[...]
        # zero non-pixel lanes (they become conv2's zero padding)
        h = jnp.maximum(h, 0.0) * mask_ref[...]

        # 128-lane-aligned store into the mid buffer (the -(Wp+1) shift is
        # folded into conv2's static tap offsets via `base2`).
        mid_ref[:, HEAD:HEAD + LA] = h

        # --- Stage 3: conv2 (+folded BN) + ReLU --------------------------
        for t in range(9):
            off = base2 + (t // 3) * Wp + (t % 3)
            stk2_ref[t * Cmid:(t + 1) * Cmid, :] = mid_ref[:, off:off + LA]
        out = jnp.dot(w2_ref[...], stk2_ref[...],
                      preferred_element_type=jnp.float32) + b2_ref[...]
        # lane-dense (Cout, LA) store; padding lanes are stripped in the wrapper
        o_ref[0] = jnp.maximum(out, 0.0).astype(o_ref.dtype)

    # VMEM sizing (f32 bytes, double-buffered per-batch blocks); explicit limit
    # (>= default scoped limit, capped at 64 MiB so it is valid on v7x too).
    vmem_est = 4 * (2 * (C1 * H1 * W1 + C2 * (LA + TAIL) + Cout * LA)
                    + H1 * W1 * LA + LA
                    + Cmid * 9 * Cin + Cout * 9 * Cmid + Cmid + Cout
                    + C1 * (LA + TAIL) + 9 * Cin * LA
                    + Cmid * (HEAD + LA + TAIL) + 9 * Cmid * LA)
    vmem_limit = int(min(max(32 * 2 ** 20, 2 * vmem_est), 64 * 2 ** 20))

    out_raw = pl.pallas_call(
        kernel,
        out_shape=jax.ShapeDtypeStruct((N, Cout, LA), x1.dtype),
        grid_spec=pltpu.PrefetchScalarGridSpec(
            num_scalar_prefetch=0,
            grid=(N,),                                  # one batch per step
            in_specs=[
                pl.BlockSpec((1, LA), lambda n: (0, 0)),               # mask
                pl.BlockSpec((1, C1, H1 * W1), lambda n: (n, 0, 0)),   # x1
                pl.BlockSpec((H1 * W1, LA), lambda n: (0, 0)),         # m_up
                pl.BlockSpec((1, C2, LA + TAIL), lambda n: (n, 0, 0)),  # x2 slab
                pl.BlockSpec((Cmid, 9 * Cin), lambda n: (0, 0)),       # w1s
                pl.BlockSpec((Cmid, 1), lambda n: (0, 0)),             # b1
                pl.BlockSpec((Cout, 9 * Cmid), lambda n: (0, 0)),      # w2s
                pl.BlockSpec((Cout, 1), lambda n: (0, 0)),             # b2
            ],
            out_specs=pl.BlockSpec((1, Cout, LA), lambda n: (n, 0, 0)),
            scratch_shapes=[
                pltpu.VMEM((C1, LA + TAIL), jnp.float32),              # x1 upsampled
                pltpu.VMEM((9 * Cin, LA), jnp.float32),                # conv1 tap stack
                pltpu.VMEM((Cmid, HEAD + LA + TAIL), jnp.float32),     # mid buffer
                pltpu.VMEM((9 * Cmid, LA), jnp.float32),               # conv2 tap stack
            ]),
        compiler_params=pltpu.CompilerParams(
            dimension_semantics=("parallel",),
            vmem_limit_bytes=vmem_limit),
    )(mask, x1f, m_up, x2f, w1s, b1c, w2s, b2c)

    # strip padding columns / garbage lanes and restore NCHW
    out = out_raw[:, :, :H2 * Wp].reshape(N, Cout, H2, Wp)[..., :W2]
    return out


# --------------------------------------------------------------------------
# Up.forward
# --------------------------------------------------------------------------
def up_forward(x1, x2, params):
    w1f, b1f = _fold_bn(params["w1"], params["b1"], params["bn1"])
    w2f, b2f = _fold_bn(params["w2"], params["b2"], params["bn2"])
    return up_fused(x1, x2, w1f, b1f, w2f, b2f)


# --------------------------------------------------------------------------
# Pure-JAX reference of the PyTorch forward (eval-mode BN).
# --------------------------------------------------------------------------
def reference_up(x1, x2, params, eps=1e-5):
    N, C1, H1, W1 = x1.shape
    ah = jnp.asarray(_interp_matrix(H1, 2 * H1))
    aw = jnp.asarray(_interp_matrix(W1, 2 * W1))
    hi = jax.lax.Precision.HIGHEST
    x1u = jnp.einsum("oh,nchw->ncow", ah, x1, precision=hi)
    x1u = jnp.einsum("pw,ncow->ncop", aw, x1u, precision=hi)
    dY = x2.shape[2] - x1u.shape[2]
    dX = x2.shape[3] - x1u.shape[3]
    x1p = jnp.pad(x1u, ((0, 0), (0, 0),
                        (dY // 2, dY - dY // 2),
                        (dX // 2, dX - dX // 2)))
    x = jnp.concatenate([x2, x1p], axis=1)

    def conv_bn_relu(x, w, b, bn):
        gamma, beta, mean, var = bn
        y = jax.lax.conv_general_dilated(
            x, w, window_strides=(1, 1), padding=((1, 1), (1, 1)),
            dimension_numbers=("NCHW", "OIHW", "NCHW"), precision=hi)
        y = y + b[None, :, None, None]
        y = (y - mean[None, :, None, None]) * (
            gamma[None, :, None, None] / jnp.sqrt(var[None, :, None, None] + eps)
        ) + beta[None, :, None, None]
        return jnp.maximum(y, 0.0)

    y = conv_bn_relu(x, params["w1"], params["b1"], params["bn1"])
    y = conv_bn_relu(y, params["w2"], params["b2"], params["bn2"])
    return y


if __name__ == "__main__":
    key = jax.random.PRNGKey(0)
    ks = jax.random.split(key, 14)

    # Up(in_channels=8, out_channels=8, bilinear=True): x1 has 4 ch (upsampled),
    # x2 has 4 ch (skip); concat -> 8 ch; mid_channels = in_channels // 2 = 4.
    N = 2
    C1, H1, W1 = 4, 7, 7       # x1: upsampled 7->14, padded 14->16
    C2, H2, W2 = 4, 16, 16     # x2: skip connection
    Cin = C1 + C2              # 8
    Cmid = Cin // 2            # 4
    Cout = 8

    x1 = jax.random.normal(ks[0], (N, C1, H1, W1), dtype=jnp.float32)
    x2 = jax.random.normal(ks[1], (N, C2, H2, W2), dtype=jnp.float32)

    params = {
        "w1": jax.random.normal(ks[2], (Cmid, Cin, 3, 3), jnp.float32) * 0.2,
        "b1": jax.random.normal(ks[3], (Cmid,), jnp.float32) * 0.1,
        "bn1": (jax.random.uniform(ks[4], (Cmid,), jnp.float32, 0.5, 1.5),   # gamma
                jax.random.normal(ks[5], (Cmid,), jnp.float32) * 0.1,        # beta
                jax.random.normal(ks[6], (Cmid,), jnp.float32) * 0.1,        # mean
                jax.random.uniform(ks[7], (Cmid,), jnp.float32, 0.5, 1.5)),  # var
        "w2": jax.random.normal(ks[8], (Cout, Cmid, 3, 3), jnp.float32) * 0.2,
        "b2": jax.random.normal(ks[9], (Cout,), jnp.float32) * 0.1,
        "bn2": (jax.random.uniform(ks[10], (Cout,), jnp.float32, 0.5, 1.5),
                jax.random.normal(ks[11], (Cout,), jnp.float32) * 0.1,
                jax.random.normal(ks[12], (Cout,), jnp.float32) * 0.1,
                jax.random.uniform(ks[13], (Cout,), jnp.float32, 0.5, 1.5)),
    }

    out = jax.jit(up_forward)(x1, x2, params)
    out = jax.block_until_ready(out)

    ref = reference_up(x1, x2, params)
    assert out.shape == (N, Cout, H2, W2), out.shape
    # tolerance budgets for MXU f32 pass rounding vs. the HIGHEST-precision ref
    assert jnp.allclose(out, ref, atol=1e-2, rtol=1e-2), float(
        jnp.max(jnp.abs(out - ref)))

    print("KERNEL_OK")
</pallas_src>

<mosaic_0001>
module attributes {stable_mosaic.version = 11 : i64} {
  func.func @kernel(%arg0: i32, %arg1: memref<1x384xf32, #tpu.memory_space<vmem>>, %arg2: memref<1x4x49xf32, #tpu.memory_space<vmem>>, %arg3: memref<49x384xf32, #tpu.memory_space<vmem>>, %arg4: memref<1x4x512xf32, #tpu.memory_space<vmem>>, %arg5: memref<4x72xf32, #tpu.memory_space<vmem>>, %arg6: memref<4x1xf32, #tpu.memory_space<vmem>>, %arg7: memref<8x36xf32, #tpu.memory_space<vmem>>, %arg8: memref<8x1xf32, #tpu.memory_space<vmem>>, %arg9: memref<1x8x384xf32, #tpu.memory_space<vmem>>, %arg10: memref<4x512xf32, #tpu.memory_space<vmem>>, %arg11: memref<72x384xf32, #tpu.memory_space<vmem>>, %arg12: memref<4x640xf32, #tpu.memory_space<vmem>>, %arg13: memref<36x384xf32, #tpu.memory_space<vmem>>) attributes {dimension_semantics = [#tpu.dimension_semantics<parallel>], iteration_bounds = array<i64: 2>, scalar_prefetch = 0 : i64, scratch_operands = 4 : i64, tpu.core_type = #tpu.core_type<tc>, window_params = [{pipeline_mode = #tpu.pipeline_mode<synchronous>, transform_indices = @transform_0, window_bounds = array<i64: 1, 384>}, {transform_indices = @transform_1, window_bounds = array<i64: 1, 4, 49>}, {pipeline_mode = #tpu.pipeline_mode<synchronous>, transform_indices = @transform_2, window_bounds = array<i64: 49, 384>}, {transform_indices = @transform_3, window_bounds = array<i64: 1, 4, 512>}, {pipeline_mode = #tpu.pipeline_mode<synchronous>, transform_indices = @transform_4, window_bounds = array<i64: 4, 72>}, {pipeline_mode = #tpu.pipeline_mode<synchronous>, transform_indices = @transform_5, window_bounds = array<i64: 4, 1>}, {pipeline_mode = #tpu.pipeline_mode<synchronous>, transform_indices = @transform_6, window_bounds = array<i64: 8, 36>}, {pipeline_mode = #tpu.pipeline_mode<synchronous>, transform_indices = @transform_7, window_bounds = array<i64: 8, 1>}, {transform_indices = @transform_8, window_bounds = array<i64: 1, 8, 384>}]} {
    %cst = arith.constant 0.000000e+00 : f32
    %0 = vector.broadcast %cst : f32 to vector<4x128xf32>
    %c0 = arith.constant 0 : index
    %c384 = arith.constant 384 : index
    %1 = vector.load %arg10[%c0, %c384] : memref<4x512xf32, #tpu.memory_space<vmem>>, vector<4x128xf32>
    tpu.vector_store %arg10[%c0, %c384], %0 {strides = array<i32>} : memref<4x512xf32, #tpu.memory_space<vmem>>, vector<4x128xf32>,
    %cst_0 = arith.constant 0.000000e+00 : f32
    %2 = vector.broadcast %cst_0 : f32 to vector<4x128xf32>
    %c0_1 = arith.constant 0 : index
    %c0_2 = arith.constant 0 : index
    %3 = vector.load %arg12[%c0_1, %c0_2] : memref<4x640xf32, #tpu.memory_space<vmem>>, vector<4x128xf32>
    tpu.vector_store %arg12[%c0_1, %c0_2], %2 {strides = array<i32>} : memref<4x640xf32, #tpu.memory_space<vmem>>, vector<4x128xf32>,
    %cst_3 = arith.constant 0.000000e+00 : f32
    %4 = vector.broadcast %cst_3 : f32 to vector<4x128xf32>
    %c0_4 = arith.constant 0 : index
    %c512 = arith.constant 512 : index
    %5 = vector.load %arg12[%c0_4, %c512] : memref<4x640xf32, #tpu.memory_space<vmem>>, vector<4x128xf32>
    tpu.vector_store %arg12[%c0_4, %c512], %4 {strides = array<i32>} : memref<4x640xf32, #tpu.memory_space<vmem>>, vector<4x128xf32>,
    %c0_5 = arith.constant 0 : index
    %c0_6 = arith.constant 0 : index
    %c0_7 = arith.constant 0 : index
    %6 = vector.load %arg2[%c0_5, %c0_6, %c0_7] : memref<1x4x49xf32, #tpu.memory_space<vmem>>, vector<1x4x49xf32>
    %7 = vector.shape_cast %6 : vector<1x4x49xf32> to vector<4x49xf32>
    %c0_8 = arith.constant 0 : index
    %c0_9 = arith.constant 0 : index
    %8 = vector.load %arg3[%c0_8, %c0_9] : memref<49x384xf32, #tpu.memory_space<vmem>>, vector<49x384xf32>
    %cst_10 = arith.constant dense<0.000000e+00> : vector<4x384xf32>
    %9 = tpu.matmul %7, %8, %cst_10 {dimension_numbers = #tpu.dot_dimension_numbers<[1], [0], [0], [1], [0, 0, 1, 1], [], []>} : vector<4x49xf32>, vector<49x384xf32>, vector<4x384xf32> -> vector<4x384xf32>
    %c0_11 = arith.constant 0 : index
    %c0_12 = arith.constant 0 : index
    %10 = vector.load %arg10[%c0_11, %c0_12] : memref<4x512xf32, #tpu.memory_space<vmem>>, vector<4x384xf32>
    tpu.vector_store %arg10[%c0_11, %c0_12], %9 {strides = array<i32>} : memref<4x512xf32, #tpu.memory_space<vmem>>, vector<4x384xf32>,
    %c0_13 = arith.constant 0 : index
    %c0_14 = arith.constant 0 : index
    %c0_15 = arith.constant 0 : index
    %11 = vector.load %arg4[%c0_13, %c0_14, %c0_15] : memref<1x4x512xf32, #tpu.memory_space<vmem>>, vector<1x4x384xf32>
    %12 = vector.shape_cast %11 : vector<1x4x384xf32> to vector<4x384xf32>
    %c0_16 = arith.constant 0 : index
    %c0_17 = arith.constant 0 : index
    %13 = vector.load %arg11[%c0_16, %c0_17] : memref<72x384xf32, #tpu.memory_space<vmem>>, vector<4x384xf32>
    tpu.vector_store %arg11[%c0_16, %c0_17], %12 {strides = array<i32>} : memref<72x384xf32, #tpu.memory_space<vmem>>, vector<4x384xf32>,
    %c0_18 = arith.constant 0 : index
    %c0_19 = arith.constant 0 : index
    %14 = vector.load %arg10[%c0_18, %c0_19] : memref<4x512xf32, #tpu.memory_space<vmem>>, vector<4x384xf32>
    %c4 = arith.constant 4 : index
    %c0_20 = arith.constant 0 : index
    %15 = vector.load %arg11[%c4, %c0_20] : memref<72x384xf32, #tpu.memory_space<vmem>>, vector<4x384xf32>
    tpu.vector_store %arg11[%c4, %c0_20], %14 {strides = array<i32>} : memref<72x384xf32, #tpu.memory_space<vmem>>, vector<4x384xf32>,
    %c0_21 = arith.constant 0 : index
    %c0_22 = arith.constant 0 : index
    %c1 = arith.constant 1 : index
    %16 = vector.load %arg4[%c0_21, %c0_22, %c1] : memref<1x4x512xf32, #tpu.memory_space<vmem>>, vector<1x4x384xf32>
    %17 = vector.shape_cast %16 : vector<1x4x384xf32> to vector<4x384xf32>
    %c8 = arith.constant 8 : index
    %c0_23 = arith.constant 0 : index
    %18 = vector.load %arg11[%c8, %c0_23] : memref<72x384xf32, #tpu.memory_space<vmem>>, vector<4x384xf32>
    tpu.vector_store %arg11[%c8, %c0_23], %17 {strides = array<i32>} : memref<72x384xf32, #tpu.memory_space<vmem>>, vector<4x384xf32>,
    %c0_24 = arith.constant 0 : index
    %c1_25 = arith.constant 1 : index
    %19 = vector.load %arg10[%c0_24, %c1_25] : memref<4x512xf32, #tpu.memory_space<vmem>>, vector<4x384xf32>
    %c12 = arith.constant 12 : index
    %c0_26 = arith.constant 0 : index
    %20 = vector.load %arg11[%c12, %c0_26] : memref<72x384xf32, #tpu.memory_space<vmem>>, vector<4x384xf32>
    tpu.vector_store %arg11[%c12, %c0_26], %19 {strides = array<i32>} : memref<72x384xf32, #tpu.memory_space<vmem>>, vector<4x384xf32>,
    %c0_27 = arith.constant 0 : index
    %c0_28 = arith.constant 0 : index
    %c2 = arith.constant 2 : index
    %21 = vector.load %arg4[%c0_27, %c0_28, %c2] : memref<1x4x512xf32, #tpu.memory_space<vmem>>, vector<1x4x384xf32>
    %22 = vector.shape_cast %21 : vector<1x4x384xf32> to vector<4x384xf32>
    %c16 = arith.constant 16 : index
    %c0_29 = arith.constant 0 : index
    %23 = vector.load %arg11[%c16, %c0_29] : memref<72x384xf32, #tpu.memory_space<vmem>>, vector<4x384xf32>
    tpu.vector_store %arg11[%c16, %c0_29], %22 {strides = array<i32>} : memref<72x384xf32, #tpu.memory_space<vmem>>, vector<4x384xf32>,
    %c0_30 = arith.constant 0 : index
    %c2_31 = arith.constant 2 : index
    %24 = vector.load %arg10[%c0_30, %c2_31] : memref<4x512xf32, #tpu.memory_space<vmem>>, vector<4x384xf32>
    %c20 = arith.constant 20 : index
    %c0_32 = arith.constant 0 : index
    %25 = vector.load %arg11[%c20, %c0_32] : memref<72x384xf32, #tpu.memory_space<vmem>>, vector<4x384xf32>
    tpu.vector_store %arg11[%c20, %c0_32], %24 {strides = array<i32>} : memref<72x384xf32, #tpu.memory_space<vmem>>, vector<4x384xf32>,
    %c0_33 = arith.constant 0 : index
    %c0_34 = arith.constant 0 : index
    %c18 = arith.constant 18 : index
    %26 = vector.load %arg4[%c0_33, %c0_34, %c18] : memref<1x4x512xf32, #tpu.memory_space<vmem>>, vector<1x4x384xf32>
    %27 = vector.shape_cast %26 : vector<1x4x384xf32> to vector<4x384xf32>
    %c24 = arith.constant 24 : index
    %c0_35 = arith.constant 0 : index
    %28 = vector.load %arg11[%c24, %c0_35] : memref<72x384xf32, #tpu.memory_space<vmem>>, vector<4x384xf32>
    tpu.vector_store %arg11[%c24, %c0_35], %27 {strides = array<i32>} : memref<72x384xf32, #tpu.memory_space<vmem>>, vector<4x384xf32>,
    %c0_36 = arith.constant 0 : index
    %c18_37 = arith.constant 18 : index
    %29 = vector.load %arg10[%c0_36, %c18_37] : memref<4x512xf32, #tpu.memory_space<vmem>>, vector<4x384xf32>
    %c28 = arith.constant 28 : index
    %c0_38 = arith.constant 0 : index
    %30 = vector.load %arg11[%c28, %c0_38] : memref<72x384xf32, #tpu.memory_space<vmem>>, vector<4x384xf32>
    tpu.vector_store %arg11[%c28, %c0_38], %29 {strides = array<i32>} : memref<72x384xf32, #tpu.memory_space<vmem>>, vector<4x384xf32>,
    %c0_39 = arith.constant 0 : index
    %c0_40 = arith.constant 0 : index
    %c19 = arith.constant 19 : index
    %31 = vector.load %arg4[%c0_39, %c0_40, %c19] : memref<1x4x512xf32, #tpu.memory_space<vmem>>, vector<1x4x384xf32>
    %32 = vector.shape_cast %31 : vector<1x4x384xf32> to vector<4x384xf32>
    %c32 = arith.constant 32 : index
    %c0_41 = arith.constant 0 : index
    %33 = vector.load %arg11[%c32, %c0_41] : memref<72x384xf32, #tpu.memory_space<vmem>>, vector<4x384xf32>
    tpu.vector_store %arg11[%c32, %c0_41], %32 {strides = array<i32>} : memref<72x384xf32, #tpu.memory_space<vmem>>, vector<4x384xf32>,
    %c0_42 = arith.constant 0 : index
    %c19_43 = arith.constant 19 : index
    %34 = vector.load %arg10[%c0_42, %c19_43] : memref<4x512xf32, #tpu.memory_space<vmem>>, vector<4x384xf32>
    %c36 = arith.constant 36 : index
    %c0_44 = arith.constant 0 : index
    %35 = vector.load %arg11[%c36, %c0_44] : memref<72x384xf32, #tpu.memory_space<vmem>>, vector<4x384xf32>
    tpu.vector_store %arg11[%c36, %c0_44], %34 {strides = array<i32>} : memref<72x384xf32, #tpu.memory_space<vmem>>, vector<4x384xf32>,
    %c0_45 = arith.constant 0 : index
    %c0_46 = arith.constant 0 : index
    %c20_47 = arith.constant 20 : index
    %36 = vector.load %arg4[%c0_45, %c0_46, %c20_47] : memref<1x4x512xf32, #tpu.memory_space<vmem>>, vector<1x4x384xf32>
    %37 = vector.shape_cast %36 : vector<1x4x384xf32> to vector<4x384xf32>
    %c40 = arith.constant 40 : index
    %c0_48 = arith.constant 0 : index
    %38 = vector.load %arg11[%c40, %c0_48] : memref<72x384xf32, #tpu.memory_space<vmem>>, vector<4x384xf32>
    tpu.vector_store %arg11[%c40, %c0_48], %37 {strides = array<i32>} : memref<72x384xf32, #tpu.memory_space<vmem>>, vector<4x384xf32>,
    %c0_49 = arith.constant 0 : index
    %c20_50 = arith.constant 20 : index
    %39 = vector.load %arg10[%c0_49, %c20_50] : memref<4x512xf32, #tpu.memory_space<vmem>>, vector<4x384xf32>
    %c44 = arith.constant 44 : index
    %c0_51 = arith.constant 0 : index
    %40 = vector.load %arg11[%c44, %c0_51] : memref<72x384xf32, #tpu.memory_space<vmem>>, vector<4x384xf32>
    tpu.vector_store %arg11[%c44, %c0_51], %39 {strides = array<i32>} : memref<72x384xf32, #tpu.memory_space<vmem>>, vector<4x384xf32>,
    %c0_52 = arith.constant 0 : index
    %c0_53 = arith.constant 0 : index
    %c36_54 = arith.constant 36 : index
    %41 = vector.load %arg4[%c0_52, %c0_53, %c36_54] : memref<1x4x512xf32, #tpu.memory_space<vmem>>, vector<1x4x384xf32>
    %42 = vector.shape_cast %41 : vector<1x4x384xf32> to vector<4x384xf32>
    %c48 = arith.constant 48 : index
    %c0_55 = arith.constant 0 : index
    %43 = vector.load %arg11[%c48, %c0_55] : memref<72x384xf32, #tpu.memory_space<vmem>>, vector<4x384xf32>
    tpu.vector_store %arg11[%c48, %c0_55], %42 {strides = array<i32>} : memref<72x384xf32, #tpu.memory_space<vmem>>, vector<4x384xf32>,
    %c0_56 = arith.constant 0 : index
    %c36_57 = arith.constant 36 : index
    %44 = vector.load %arg10[%c0_56, %c36_57] : memref<4x512xf32, #tpu.memory_space<vmem>>, vector<4x384xf32>
    %c52 = arith.constant 52 : index
    %c0_58 = arith.constant 0 : index
    %45 = vector.load %arg11[%c52, %c0_58] : memref<72x384xf32, #tpu.memory_space<vmem>>, vector<4x384xf32>
    tpu.vector_store %arg11[%c52, %c0_58], %44 {strides = array<i32>} : memref<72x384xf32, #tpu.memory_space<vmem>>, vector<4x384xf32>,
    %c0_59 = arith.constant 0 : index
    %c0_60 = arith.constant 0 : index
    %c37 = arith.constant 37 : index
    %46 = vector.load %arg4[%c0_59, %c0_60, %c37] : memref<1x4x512xf32, #tpu.memory_space<vmem>>, vector<1x4x384xf32>
    %47 = vector.shape_cast %46 : vector<1x4x384xf32> to vector<4x384xf32>
    %c56 = arith.constant 56 : index
    %c0_61 = arith.constant 0 : index
    %48 = vector.load %arg11[%c56, %c0_61] : memref<72x384xf32, #tpu.memory_space<vmem>>, vector<4x384xf32>
    tpu.vector_store %arg11[%c56, %c0_61], %47 {strides = array<i32>} : memref<72x384xf32, #tpu.memory_space<vmem>>, vector<4x384xf32>,
    %c0_62 = arith.constant 0 : index
    %c37_63 = arith.constant 37 : index
    %49 = vector.load %arg10[%c0_62, %c37_63] : memref<4x512xf32, #tpu.memory_space<vmem>>, vector<4x384xf32>
    %c60 = arith.constant 60 : index
    %c0_64 = arith.constant 0 : index
    %50 = vector.load %arg11[%c60, %c0_64] : memref<72x384xf32, #tpu.memory_space<vmem>>, vector<4x384xf32>
    tpu.vector_store %arg11[%c60, %c0_64], %49 {strides = array<i32>} : memref<72x384xf32, #tpu.memory_space<vmem>>, vector<4x384xf32>,
    %c0_65 = arith.constant 0 : index
    %c0_66 = arith.constant 0 : index
    %c38 = arith.constant 38 : index
    %51 = vector.load %arg4[%c0_65, %c0_66, %c38] : memref<1x4x512xf32, #tpu.memory_space<vmem>>, vector<1x4x384xf32>
    %52 = vector.shape_cast %51 : vector<1x4x384xf32> to vector<4x384xf32>
    %c64 = arith.constant 64 : index
    %c0_67 = arith.constant 0 : index
    %53 = vector.load %arg11[%c64, %c0_67] : memref<72x384xf32, #tpu.memory_space<vmem>>, vector<4x384xf32>
    tpu.vector_store %arg11[%c64, %c0_67], %52 {strides = array<i32>} : memref<72x384xf32, #tpu.memory_space<vmem>>, vector<4x384xf32>,
    %c0_68 = arith.constant 0 : index
    %c38_69 = arith.constant 38 : index
    %54 = vector.load %arg10[%c0_68, %c38_69] : memref<4x512xf32, #tpu.memory_space<vmem>>, vector<4x384xf32>
    %c68 = arith.constant 68 : index
    %c0_70 = arith.constant 0 : index
    %55 = vector.load %arg11[%c68, %c0_70] : memref<72x384xf32, #tpu.memory_space<vmem>>, vector<4x384xf32>
    tpu.vector_store %arg11[%c68, %c0_70], %54 {strides = array<i32>} : memref<72x384xf32, #tpu.memory_space<vmem>>, vector<4x384xf32>,
    %c0_71 = arith.constant 0 : index
    %c0_72 = arith.constant 0 : index
    %56 = vector.load %arg5[%c0_71, %c0_72] : memref<4x72xf32, #tpu.memory_space<vmem>>, vector<4x72xf32>
    %c0_73 = arith.constant 0 : index
    %c0_74 = arith.constant 0 : index
    %57 = vector.load %arg11[%c0_73, %c0_74] : memref<72x384xf32, #tpu.memory_space<vmem>>, vector<72x384xf32>
    %cst_75 = arith.constant dense<0.000000e+00> : vector<4x384xf32>
    %58 = tpu.matmul %56, %57, %cst_75 {dimension_numbers = #tpu.dot_dimension_numbers<[1], [0], [0], [1], [0, 0, 1, 1], [], []>} : vector<4x72xf32>, vector<72x384xf32>, vector<4x384xf32> -> vector<4x384xf32>
    %c0_76 = arith.constant 0 : index
    %c0_77 = arith.constant 0 : index
    %59 = vector.load %arg6[%c0_76, %c0_77] : memref<4x1xf32, #tpu.memory_space<vmem>>, vector<4x1xf32>
    %60 = vector.broadcast %59 : vector<4x1xf32> to vector<4x384xf32>
    %61 = arith.addf %58, %60 : vector<4x384xf32>
    %cst_78 = arith.constant 0.000000e+00 : f32
    %62 = vector.broadcast %cst_78 : f32 to vector<4x384xf32>
    %63 = arith.maximumf %61, %62 : vector<4x384xf32>
    %c0_79 = arith.constant 0 : index
    %c0_80 = arith.constant 0 : index
    %64 = vector.load %arg1[%c0_79, %c0_80] : memref<1x384xf32, #tpu.memory_space<vmem>>, vector<1x384xf32>
    %65 = vector.broadcast %64 : vector<1x384xf32> to vector<4x384xf32>
    %66 = arith.mulf %63, %65 : vector<4x384xf32>
    %c0_81 = arith.constant 0 : index
    %c128 = arith.constant 128 : index
    %67 = vector.load %arg12[%c0_81, %c128] : memref<4x640xf32, #tpu.memory_space<vmem>>, vector<4x384xf32>
    tpu.vector_store %arg12[%c0_81, %c128], %66 {strides = array<i32>} : memref<4x640xf32, #tpu.memory_space<vmem>>, vector<4x384xf32>,
    %c0_82 = arith.constant 0 : index
    %c109 = arith.constant 109 : index
    %68 = vector.load %arg12[%c0_82, %c109] : memref<4x640xf32, #tpu.memory_space<vmem>>, vector<4x384xf32>
    %c0_83 = arith.constant 0 : index
    %c0_84 = arith.constant 0 : index
    %69 = vector.load %arg13[%c0_83, %c0_84] : memref<36x384xf32, #tpu.memory_space<vmem>>, vector<4x384xf32>
    tpu.vector_store %arg13[%c0_83, %c0_84], %68 {strides = array<i32>} : memref<36x384xf32, #tpu.memory_space<vmem>>, vector<4x384xf32>,
    %c0_85 = arith.constant 0 : index
    %c110 = arith.constant 110 : index
    %70 = vector.load %arg12[%c0_85, %c110] : memref<4x640xf32, #tpu.memory_space<vmem>>, vector<4x384xf32>
    %c4_86 = arith.constant 4 : index
    %c0_87 = arith.constant 0 : index
    %71 = vector.load %arg13[%c4_86, %c0_87] : memref<36x384xf32, #tpu.memory_space<vmem>>, vector<4x384xf32>
    tpu.vector_store %arg13[%c4_86, %c0_87], %70 {strides = array<i32>} : memref<36x384xf32, #tpu.memory_space<vmem>>, vector<4x384xf32>,
    %c0_88 = arith.constant 0 : index
    %c111 = arith.constant 111 : index
    %72 = vector.load %arg12[%c0_88, %c111] : memref<4x640xf32, #tpu.memory_space<vmem>>, vector<4x384xf32>
    %c8_89 = arith.constant 8 : index
    %c0_90 = arith.constant 0 : index
    %73 = vector.load %arg13[%c8_89, %c0_90] : memref<36x384xf32, #tpu.memory_space<vmem>>, vector<4x384xf32>
    tpu.vector_store %arg13[%c8_89, %c0_90], %72 {strides = array<i32>} : memref<36x384xf32, #tpu.memory_space<vmem>>, vector<4x384xf32>,
    %c0_91 = arith.constant 0 : index
    %c127 = arith.constant 127 : index
    %74 = vector.load %arg12[%c0_91, %c127] : memref<4x640xf32, #tpu.memory_space<vmem>>, vector<4x384xf32>
    %c12_92 = arith.constant 12 : index
    %c0_93 = arith.constant 0 : index
    %75 = vector.load %arg13[%c12_92, %c0_93] : memref<36x384xf32, #tpu.memory_space<vmem>>, vector<4x384xf32>
    tpu.vector_store %arg13[%c12_92, %c0_93], %74 {strides = array<i32>} : memref<36x384xf32, #tpu.memory_space<vmem>>, vector<4x384xf32>,
    %c0_94 = arith.constant 0 : index
    %c128_95 = arith.constant 128 : index
    %76 = vector.load %arg12[%c0_94, %c128_95] : memref<4x640xf32, #tpu.memory_space<vmem>>, vector<4x384xf32>
    %c16_96 = arith.constant 16 : index
    %c0_97 = arith.constant 0 : index
    %77 = vector.load %arg13[%c16_96, %c0_97] : memref<36x384xf32, #tpu.memory_space<vmem>>, vector<4x384xf32>
    tpu.vector_store %arg13[%c16_96, %c0_97], %76 {strides = array<i32>} : memref<36x384xf32, #tpu.memory_space<vmem>>, vector<4x384xf32>,
    %c0_98 = arith.constant 0 : index
    %c129 = arith.constant 129 : index
    %78 = vector.load %arg12[%c0_98, %c129] : memref<4x640xf32, #tpu.memory_space<vmem>>, vector<4x384xf32>
    %c20_99 = arith.constant 20 : index
    %c0_100 = arith.constant 0 : index
    %79 = vector.load %arg13[%c20_99, %c0_100] : memref<36x384xf32, #tpu.memory_space<vmem>>, vector<4x384xf32>
    tpu.vector_store %arg13[%c20_99, %c0_100], %78 {strides = array<i32>} : memref<36x384xf32, #tpu.memory_space<vmem>>, vector<4x384xf32>,
    %c0_101 = arith.constant 0 : index
    %c145 = arith.constant 145 : index
    %80 = vector.load %arg12[%c0_101, %c145] : memref<4x640xf32, #tpu.memory_space<vmem>>, vector<4x384xf32>
    %c24_102 = arith.constant 24 : index
    %c0_103 = arith.constant 0 : index
    %81 = vector.load %arg13[%c24_102, %c0_103] : memref<36x384xf32, #tpu.memory_space<vmem>>, vector<4x384xf32>
    tpu.vector_store %arg13[%c24_102, %c0_103], %80 {strides = array<i32>} : memref<36x384xf32, #tpu.memory_space<vmem>>, vector<4x384xf32>,
    %c0_104 = arith.constant 0 : index
    %c146 = arith.constant 146 : index
    %82 = vector.load %arg12[%c0_104, %c146] : memref<4x640xf32, #tpu.memory_space<vmem>>, vector<4x384xf32>
    %c28_105 = arith.constant 28 : index
    %c0_106 = arith.constant 0 : index
    %83 = vector.load %arg13[%c28_105, %c0_106] : memref<36x384xf32, #tpu.memory_space<vmem>>, vector<4x384xf32>
    tpu.vector_store %arg13[%c28_105, %c0_106], %82 {strides = array<i32>} : memref<36x384xf32, #tpu.memory_space<vmem>>, vector<4x384xf32>,
    %c0_107 = arith.constant 0 : index
    %c147 = arith.constant 147 : index
    %84 = vector.load %arg12[%c0_107, %c147] : memref<4x640xf32, #tpu.memory_space<vmem>>, vector<4x384xf32>
    %c32_108 = arith.constant 32 : index
    %c0_109 = arith.constant 0 : index
    %85 = vector.load %arg13[%c32_108, %c0_109] : memref<36x384xf32, #tpu.memory_space<vmem>>, vector<4x384xf32>
    tpu.vector_store %arg13[%c32_108, %c0_109], %84 {strides = array<i32>} : memref<36x384xf32, #tpu.memory_space<vmem>>, vector<4x384xf32>,
    %c0_110 = arith.constant 0 : index
    %c0_111 = arith.constant 0 : index
    %86 = vector.load %arg7[%c0_110, %c0_111] : memref<8x36xf32, #tpu.memory_space<vmem>>, vector<8x36xf32>
    %c0_112 = arith.constant 0 : index
    %c0_113 = arith.constant 0 : index
    %87 = vector.load %arg13[%c0_112, %c0_113] : memref<36x384xf32, #tpu.memory_space<vmem>>, vector<36x384xf32>
    %cst_114 = arith.constant dense<0.000000e+00> : vector<8x384xf32>
    %88 = tpu.matmul %86, %87, %cst_114 {dimension_numbers = #tpu.dot_dimension_numbers<[1], [0], [0], [1], [0, 0, 1, 1], [], []>} : vector<8x36xf32>, vector<36x384xf32>, vector<8x384xf32> -> vector<8x384xf32>
    %c0_115 = arith.constant 0 : index
    %c0_116 = arith.constant 0 : index
    %89 = vector.load %arg8[%c0_115, %c0_116] : memref<8x1xf32, #tpu.memory_space<vmem>>, vector<8x1xf32>
    %90 = vector.broadcast %89 : vector<8x1xf32> to vector<8x384xf32>
    %91 = arith.addf %88, %90 : vector<8x384xf32>
    %cst_117 = arith.constant 0.000000e+00 : f32
    %92 = vector.broadcast %cst_117 : f32 to vector<8x384xf32>
    %93 = arith.maximumf %91, %92 : vector<8x384xf32>
    %c0_118 = arith.constant 0 : index
    %c0_119 = arith.constant 0 : index
    %c0_120 = arith.constant 0 : index
    %94 = vector.load %arg9[%c0_118, %c0_119, %c0_120] : memref<1x8x384xf32, #tpu.memory_space<vmem>>, vector<1x8x384xf32>
    %95 = vector.shape_cast %94 : vector<1x8x384xf32> to vector<8x384xf32>
    %96 = vector.shape_cast %93 : vector<8x384xf32> to vector<1x8x384xf32>
    tpu.vector_store %arg9[%c0_118, %c0_119, %c0_120], %96 {strides = array<i32>} : memref<1x8x384xf32, #tpu.memory_space<vmem>>, vector<1x8x384xf32>,
    return
  }
  func.func @transform_0(%arg0: i32) -> (i32, i32) {
    %c0_i32 = arith.constant 0 : i32
    %c0_i32_0 = arith.constant 0 : i32
    %c0_i32_1 = arith.constant 0 : i32
    return %c0_i32, %c0_i32_0 : i32, i32
  }
  func.func @transform_1(%arg0: i32) -> (i32, i32, i32) {
    %c0_i32 = arith.constant 0 : i32
    %c0_i32_0 = arith.constant 0 : i32
    %c0_i32_1 = arith.constant 0 : i32
    return %arg0, %c0_i32, %c0_i32_0 : i32, i32, i32
  }
  func.func @transform_2(%arg0: i32) -> (i32, i32) {
    %c0_i32 = arith.constant 0 : i32
    %c0_i32_0 = arith.constant 0 : i32
    %c0_i32_1 = arith.constant 0 : i32
    return %c0_i32, %c0_i32_0 : i32, i32
  }
  func.func @transform_3(%arg0: i32) -> (i32, i32, i32) {
    %c0_i32 = arith.constant 0 : i32
    %c0_i32_0 = arith.constant 0 : i32
    %c0_i32_1 = arith.constant 0 : i32
    return %arg0, %c0_i32, %c0_i32_0 : i32, i32, i32
  }
  func.func @transform_4(%arg0: i32) -> (i32, i32) {
    %c0_i32 = arith.constant 0 : i32
    %c0_i32_0 = arith.constant 0 : i32
    %c0_i32_1 = arith.constant 0 : i32
    return %c0_i32, %c0_i32_0 : i32, i32
  }
  func.func @transform_5(%arg0: i32) -> (i32, i32) {
    %c0_i32 = arith.constant 0 : i32
    %c0_i32_0 = arith.constant 0 : i32
    %c0_i32_1 = arith.constant 0 : i32
    return %c0_i32, %c0_i32_0 : i32, i32
  }
  func.func @transform_6(%arg0: i32) -> (i32, i32) {
    %c0_i32 = arith.constant 0 : i32
    %c0_i32_0 = arith.constant 0 : i32
    %c0_i32_1 = arith.constant 0 : i32
    return %c0_i32, %c0_i32_0 : i32, i32
  }
  func.func @transform_7(%arg0: i32) -> (i32, i32) {
    %c0_i32 = arith.constant 0 : i32
    %c0_i32_0 = arith.constant 0 : i32
    %c0_i32_1 = arith.constant 0 : i32
    return %c0_i32, %c0_i32_0 : i32, i32
  }
  func.func @transform_8(%arg0: i32) -> (i32, i32, i32) {
    %c0_i32 = arith.constant 0 : i32
    %c0_i32_0 = arith.constant 0 : i32
    %c0_i32_1 = arith.constant 0 : i32
    return %arg0, %c0_i32, %c0_i32_0 : i32, i32, i32
  }
}

</mosaic_0001>

<bundles_post_ra>
// kernel: up_forward.1
= control target key start
LH: loop header
LB: loop body
LE: loop exit
PB: predicated region body
PF: predicated region fallthrough
CT: control target
= control target key end

     0   :  { %s1831_s27 = smov 0   ;;  %s2202_s0 = inlined_call_operand.vmem [shape: f32[1,384], index: 0, kind: input, shape index: {}]   ;;  %s2203_s1 = inlined_call_operand.vmem [shape: f32[2,4,49], index: 1, kind: input, shape index: {}]   ;;  %s2204_s2 = inlined_call_operand.vmem [shape: f32[49,384], index: 2, kind: input, shape index: {}]   ;;  %s2205_s3 = inlined_call_operand.vmem [shape: f32[2,4,512], index: 3, kind: input, shape index: {}]   ;;  %s2206_s4 = inlined_call_operand.vmem [shape: f32[4,72], index: 4, kind: input, shape index: {}]   ;;  %s2207_s5 = inlined_call_operand.vmem [shape: f32[4,1], index: 5, kind: input, shape index: {}]   ;;  %s2208_s6 = inlined_call_operand.vmem [shape: f32[8,36], index: 6, kind: input, shape index: {}]   ;;  %s2209_s7 = inlined_call_operand.vmem [shape: f32[8,1], index: 7, kind: input, shape index: {}]   ;;  %s2210_s8 = inlined_call_operand.vmem [shape: f32[2,8,384], index: 8, kind: output, shape index: {}]  }
   0x1 LB: > { %s1559_s28 = sadd.s32 4294967295, %s1767_s27   ;;  %p1563_p0 = scmp.ge.s32.totalorder %s1767_s27, 1  ;;  %s1767_s27 = sphi %s1831_s27, %s18_s27  }
   0x2   : > { %p271_p1 = scmp.lt.s32.totalorder %s1767_s27, 3 }
   0x4   : > { %p272_p2 = pnand %p1563_p0, %p271_p1 }
   0x5   : > { %v328_v0 = vld [vmem:[%s2204_s2 + $0x8] sm:$0xff] (!%p272_p2)  ;;  %v331_v1 = vld [vmem:[%s2204_s2 + $0x20] sm:$0xff] (!%p272_p2)  ;;  %v329_v2 = vld [vmem:[%s2204_s2 + $0x10] sm:$0xff] (!%p272_p2)  ;;  %v1769_v3 = vmov (!%p272_p2), 0.0|0.0   ;;  %v1770_v8 = vmov (!%p272_p2), 0.0   ;;  %p309_p3 = scmp.lt.s32.totalorder (!%p272_p2), %s1559_s28, 1 }
   0x6   : > { %275 = sbr.rel (%p272_p2) target bundleno = 1098 (0x44a), region = 52  ;;  %1670 = vmatprep.subr.bf16.mxu1 (!%p272_p2), %v1769_v3  ;;  %v1658_v4 = vpack.c.bf16 (!%p272_p2), %v331_v1, %v328_v0  ;;  %v332_v5 = vld [vmem:[%s2204_s2 + $0x28] sm:$0xff] (!%p272_p2)  ;;  %v327_v6 = vld [vmem:[%s2204_s2] sm:$0xff] (!%p272_p2)  ;;  %v330_v7 = vld [vmem:[%s2204_s2 + $0x18] sm:$0xff] (!%p272_p2)  ;;  %323 = vst [vmem:[#allocation2 + $0xc] sm:$0xf] (!%p272_p2), %v1770_v8  ;;  %426 = vmatprep.mubr.f32.mxu0 (!%p272_p2), %v1770_v8 }
   0x7   : > { %324 = vst [vmem:[#allocation4] sm:$0xf] (!%p272_p2), %v1770_v8  ;;  %325 = vst [vmem:[#allocation4 + $0x10] sm:$0xf] (!%p272_p2), %v1770_v8  ;;  %v1671_v9 = vpack.c.bf16 (!%p272_p2), %v332_v5, %v329_v2  ;;  %v1660_v10 = vpack.c.bf16 (!%p272_p2), %v330_v7, %v327_v6  ;;  %v334_v11 = vld [vmem:[%s2204_s2 + $0x38] sm:$0xff] (!%p272_p2)  ;;  %v337_v12 = vld [vmem:[%s2204_s2 + $0x50] sm:$0xff] (!%p272_p2) }
   0x8   : > { %v335_v13 = vld [vmem:[%s2204_s2 + $0x40] sm:$0xff] (!%p272_p2)  ;;  %vm1771_vm0 = vmmov (!%p272_p2), 0   ;;  %1659 = vmatprep.subr.bf16.mxu0 (!%p272_p2), %v1658_v4  ;;  %v1662_v14 = vpack.c.bf16 (!%p272_p2), %v337_v12, %v334_v11  ;;  %v338_v15 = vld [vmem:[%s2204_s2 + $0x58] sm:$0xff] (!%p272_p2)  ;;  %v333_v16 = vld [vmem:[%s2204_s2 + $0x30] sm:$0xff] (!%p272_p2)  ;;  %vm352_vm1 = vcmask (!%p272_p2), 1040384   ;;  %s1772_s10 = smov (!%p272_p2), 127  }
   0x9   : > { %1621 = vmatprep.mubr.msk.f32.mxu1 (!%p272_p2), %vm1771_vm0, %v1770_v8  ;;  %v336_v17 = vld [vmem:[%s2204_s2 + $0x48] sm:$0xff] (!%p272_p2)  ;;  %1672 = vmatpush3.bf16.msra.mxu1 (!%p272_p2), %v1671_v9  ;;  %v1674_v18 = vpack.c.bf16 (!%p272_p2), %v338_v15, %v335_v13  ;;  %v343_v21 = vld [vmem:[%s2204_s2 + $0x80] sm:$0xff] (!%p272_p2)  ;;  %v341_v22 = vld [vmem:[%s2204_s2 + $0x70] sm:$0xff] (!%p272_p2)  ;;  %s1773_s11 = smov (!%p272_p2), 126   ;;  %vm348_vm2 = vcmask (!%p272_p2), 400384   ;;  %s1774_s19 = smov (!%p272_p2), 110  }
   0xa   : > { %1661 = vmatpush1.bf16.msra.mxu0 (!%p272_p2), %v1660_v10  ;;  %v1664_v19 = vpack.c.bf16 (!%p272_p2), %v336_v17, %v333_v16  ;;  %v340_v20 = vld [vmem:[%s2204_s2 + $0x68] sm:$0xff] (!%p272_p2)  ;;  %1673 = vmatprep.subr.bf16.mxu1 (!%p272_p2), %v1769_v3  ;;  %v339_v25 = vld [vmem:[%s2204_s2 + $0x60] sm:$0xff] (!%p272_p2)  ;;  %v342_v26 = vld [vmem:[%s2204_s2 + $0x78] sm:$0xff] (!%p272_p2)  ;;  %s1775_s20 = smov (!%p272_p2), 109   ;;  %s1776_s21 = smov (!%p272_p2), 108   ;;  %vm542_vm3 = vcmask (!%p272_p2), 1039360  }
   0xb   : > { %1663 = vmatprep.subr.bf16.mxu0 (!%p272_p2), %v1662_v14  ;;  %v1666_v23 = vpack.c.bf16 (!%p272_p2), %v343_v21, %v340_v20  ;;  %v344_v24 = vld [vmem:[%s2204_s2 + $0x88] sm:$0xff] (!%p272_p2)  ;;  %v1668_v30 = vpack.c.bf16 (!%p272_p2), %v342_v26, %v339_v25  ;;  %v346_v32 = vld [vmem:[%s2204_s2 + $0x98] sm:$0x1] (!%p272_p2)  ;;  %v347_v33 = vld [vmem:[%s2204_s2 + $0xa0] sm:$0x1] (!%p272_p2)  ;;  %s1777_s22 = smov (!%p272_p2), 92  }
   0xc   : > { %v1677_v29 = vpack.c.bf16 (!%p272_p2), %v344_v24, %v341_v22  ;;  %v345_v34 = vld [vmem:[%s2204_s2 + $0x90] sm:$0x1] (!%p272_p2)  ;;  %s1779_s24 = smov (!%p272_p2), 90   ;;  %vm589_vm4 = vcmask (!%p272_p2), 1031168   ;;  %vm636_vm5 = vcmask (!%p272_p2), 900096   ;;  %vm683_vm6 = vcmask (!%p272_p2), 891904  }
   0xd   : > { %s2212_s28 = smov (!%p309_p3, %s1559_s28), 1  ;;  %1675 = vmatpush3.bf16.msra.mxu1 %v1674_v18  ;;  %vm730_vm7 = vcmask 883712   ;;  %vm777_vm8 = vcmask 752640   ;;  %vm824_vm9 = vcmask 744448   ;;  %vm871_vm10 = vcmask 736256   ;;  %s1781_s12 = smov 111  }
   0xe   : > { %s1582_s23 = sshll.u32 %s2212_s28, 4  ;;  %1665 = vmatpush1.bf16.msra.mxu0 %v1664_v19  ;;  %s1564_s29 = sshll.u32 %s2212_s28, 2  ;;  %1676 = vmatprep.subr.bf16.mxu1 %v1769_v3  ;;  %vm938_vm11 = vcmask 588800   ;;  %vm1253_vm12 = vcmask 908288   ;;  %vm1174_vm13 = vcmask 138240   ;;  %vm1126_vm14 = vcmask 154624  }
   0xf   : > { %s1911_s26 = scalar_lea.vmem %s2205_s3, %s1582_s23  ;;  %1667 = vmatprep.subr.bf16.mxu0 %v1666_v23  ;;  %s312_s14 = scalar_lea.vmem %s2203_s1, %s1564_s29  ;;  %vm1150_vm15 = vcmask 146432  }
  0x10   : > { %v1914_v27 = vld [vmem:[%s1911_s26 + $0x8] sm:$0xff]  ;;  %v1917_v28 = vld [vmem:[%s1911_s26] sm:$0xff]  ;;  %s1778_s23 = smov 91   ;;  %s1782_s13 = smov 18  }
  0x11   : > { %v532_v31 = vcombine.high %v1917_v28, %v1917_v28  ;;  %514 = vst [vmem:[#allocation3] sm:$0xf] %v1917_v28  ;;  %538 = vrot.lane.b32.xlu0 %v1914_v27, %s1772_s10  ;;  %585 = vrot.lane.b32.xlu1 %v1914_v27, %s1773_s11  ;;  %v326_v35 = vld [vmem:[%s312_s14] sm:$0xf]  ;;  %v1950_v36 = vcombine.high %v1914_v27, %v1914_v27  ;;  %v510_v37 = vld [vmem:[%s1911_s26 + $0x8] sm:$0xf] }
  0x12   : > { %1678 = vmatpush3.bf16.msra.mxu1 %v1677_v29  ;;  %1669 = vmatpush1.bf16.msra.mxu0 %v1668_v30  ;;  %516 = vst [vmem:[#allocation3 + $0x10] sm:$0xf] %v510_v37  ;;  %s1783_s14 = smov 1   ;;  %s1784_s15 = smov 19  }
  0x13   : > { %515 = vst [vmem:[#allocation3 + $0x8] sm:$0xf] %v532_v31  ;;  %1619 = vmatprep.subr.mxu1 %v1770_v8  ;;  %1568 = vmatprep.subr.msk.mxu0 %vm352_vm1, %v346_v32  ;;  %s1785_s16 = smov 17  }
  0x15   : > { %534 = vrot.lane.b32.xlu0 %v1917_v28, %s1772_s10  ;;  %632 = vrot.lane.b32.xlu1 %v1914_v27, %s1774_s19 }
  0x16   : > { %1620 = vmatpush3.msk.msra.mxu1 %vm352_vm1, %v347_v33  ;;  %1569 = vmatpush1.msk.msra.mxu0 %vm352_vm1, %v345_v34  ;;  %vm1335_vm1 = vcmask 1043456  }
  0x17   : > { %1622 = vmatmul.mubr.msk.f32.vlgmr.msra.gmra.mrb[0].mxu1 %vm348_vm2, %v326_v35  ;;  %1570 = vmatmul.mubr.msk.f32.vlgmr.msra.gmra.mrb[0].mxu0 %vm348_vm2, %v326_v35  ;;  %vm1331_vm2 = vcmask 293888  }
  0x18   : > { %1695 = vmatprep.subr.bf16.mxu1 %v1769_v3  ;;  %1006 = vmatprep.mubr.f32.mxu0 %v1770_v8 }
  0x19   : > { %536 = vrot.lane.b32.xlu0 %v532_v31, %s1772_s10  ;;  %679 = vrot.lane.b32.xlu1 %v1914_v27, %s1775_s20 }
  0x1a   : > { %1642 = vmatprep.mubr.msk.f32.mxu1 %vm1771_vm0, %v1770_v8 }
  0x1d   : > { %540 = vrot.lane.b32.xlu0 %v1950_v36, %s1772_s10  ;;  %726 = vrot.lane.b32.xlu1 %v1914_v27, %s1776_s21 }
  0x21   : > { %583 = vrot.lane.b32.xlu0 %v532_v31, %s1773_s11  ;;  %773 = vrot.lane.b32.xlu1 %v1914_v27, %s1777_s22 }
  0x25   : > { %630 = vrot.lane.b32.xlu0 %v532_v31, %s1774_s19  ;;  %820 = vrot.lane.b32.xlu1 %v1914_v27, %s1778_s23 }
  0x29   : > { %581 = vrot.lane.b32.xlu0 %v1917_v28, %s1773_s11  ;;  %867 = vrot.lane.b32.xlu1 %v1914_v27, %s1779_s24 }
  0x2d   : > { %628 = vrot.lane.b32.xlu0 %v1917_v28, %s1774_s19 }
  0x31   : > { %587 = vrot.lane.b32.xlu0 %v1950_v36, %s1773_s11 }
  0x35   : > { %634 = vrot.lane.b32.xlu0 %v1950_v36, %s1774_s19 }
  0x39   : > { %677 = vrot.lane.b32.xlu0 %v532_v31, %s1775_s20 }
  0x3d   : > { %724 = vrot.lane.b32.xlu0 %v532_v31, %s1776_s21 }
  0x41   : > { %675 = vrot.lane.b32.xlu0 %v1917_v28, %s1775_s20 }
  0x45   : > { %722 = vrot.lane.b32.xlu0 %v1917_v28, %s1776_s21 }
  0x49   : > { %681 = vrot.lane.b32.xlu0 %v1950_v36, %s1775_s20 }
  0x4d   : > { %728 = vrot.lane.b32.xlu0 %v1950_v36, %s1776_s21 }
  0x51   : > { %771 = vrot.lane.b32.xlu0 %v532_v31, %s1777_s22 }
  0x55   : > { %818 = vrot.lane.b32.xlu0 %v532_v31, %s1778_s23 }
  0x59   : > { %769 = vrot.lane.b32.xlu0 %v1917_v28, %s1777_s22 }
  0x5d   : > { %816 = vrot.lane.b32.xlu0 %v1917_v28, %s1778_s23 }
  0x61   : > { %775 = vrot.lane.b32.xlu0 %v1950_v36, %s1777_s22 }
  0x65   : > { %822 = vrot.lane.b32.xlu0 %v1950_v36, %s1778_s23 }
  0x69   : > { %865 = vrot.lane.b32.xlu0 %v532_v31, %s1779_s24 }
  0x83   : > { %v539_v38 = vpop.permute.xlu0 %538  ;;  %v586_v62 = vpop.permute.xlu1 %585 }
  0x87   : > { %v535_v39 = vpop.permute.xlu0 %534  ;;  %v633_v2 = vpop.permute.xlu1 %632 }
  0x8b   : > { %v537_v40 = vpop.permute.xlu0 %536  ;;  %v680_v7 = vpop.permute.xlu1 %679 }
  0x8c   : > { %v543_v41 = vsel %vm542_vm3, %v535_v39, %v537_v40  ;;  %v544_v42 = vsel %vm542_vm3, %v537_v40, %v539_v38 }
  0x8d   : > { %549 = vst [vmem:[#allocation3 + $0x18] sm:$0xf] %v543_v41  ;;  %550 = vst [vmem:[#allocation3 + $0x20] sm:$0xf] %v544_v42 }
  0x8f   : > { %v541_v43 = vpop.permute.xlu0 %540  ;;  %v727_v13 = vpop.permute.xlu1 %726 }
  0x90   : > { %v545_v44 = vsel %vm542_vm3, %v539_v38, %v541_v43 }
  0x91   : > { %551 = vst [vmem:[#allocation3 + $0x28] sm:$0xf] %v545_v44 }
  0x93   : > { %v584_v45 = vpop.permute.xlu0 %583  ;;  %v774_v18 = vpop.permute.xlu1 %773 }
  0x94   : > { %v591_v63 = vsel %vm589_vm4, %v584_v45, %v586_v62 }
  0x95   : > { %597 = vst [vmem:[#allocation3 + $0x38] sm:$0xf] %v591_v63 }
  0x97   : > { %v631_v46 = vpop.permute.xlu0 %630  ;;  %v821_v22 = vpop.permute.xlu1 %820 }
  0x98   : > { %v638_v4 = vsel %vm636_vm5, %v631_v46, %v633_v2 }
  0x99   : > { %644 = vst [vmem:[#allocation3 + $0x50] sm:$0xf] %v638_v4 }
  0x9b   : > { %v582_v47 = vpop.permute.xlu0 %581  ;;  %v2022_v25 = vpop.permute.xlu1 %867 }
  0x9c   : > { %v590_v48 = vsel %vm589_vm4, %v582_v47, %v584_v45 }
  0x9d   : > { %596 = vst [vmem:[#allocation3 + $0x30] sm:$0xf] %v590_v48 }
  0x9f   : > { %v629_v49 = vpop.permute.xlu0 %628 }
  0xa0   : > { %v637_v50 = vsel %vm636_vm5, %v629_v49, %v631_v46 }
  0xa1   : > { %643 = vst [vmem:[#allocation3 + $0x48] sm:$0xf] %v637_v50 }
  0xa3   : > { %v588_v51 = vpop.permute.xlu0 %587 }
  0xa4   : > { %v592_v0 = vsel %vm589_vm4, %v586_v62, %v588_v51 }
  0xa5   : > { %598 = vst [vmem:[#allocation3 + $0x40] sm:$0xf] %v592_v0 }
  0xa7   : > { %v635_v52 = vpop.permute.xlu0 %634 }
  0xa8   : > { %v639_v5 = vsel %vm636_vm5, %v633_v2, %v635_v52 }
  0xa9   : > { %645 = vst [vmem:[#allocation3 + $0x58] sm:$0xf] %v639_v5 }
  0xab   : > { %v678_v53 = vpop.permute.xlu0 %677 }
  0xac   : > { %v685_v9 = vsel %vm683_vm6, %v678_v53, %v680_v7 }
  0xad   : > { %691 = vst [vmem:[#allocation3 + $0x68] sm:$0xf] %v685_v9 }
  0xaf   : > { %v725_v54 = vpop.permute.xlu0 %724 }
  0xb0   : > { %v732_v14 = vsel %vm730_vm7, %v725_v54, %v727_v13 }
  0xb1   : > { %738 = vst [vmem:[#allocation3 + $0x80] sm:$0xf] %v732_v14 }
  0xb3   : > { %v676_v55 = vpop.permute.xlu0 %675 }
  0xb4   : > { %v684_v56 = vsel %vm683_vm6, %v676_v55, %v678_v53 }
  0xb5   : > { %690 = vst [vmem:[#allocation3 + $0x60] sm:$0xf] %v684_v56 }
  0xb7   : > { %v723_v57 = vpop.permute.xlu0 %722 }
  0xb8   : > { %v731_v58 = vsel %vm730_vm7, %v723_v57, %v725_v54 }
  0xb9   : > { %737 = vst [vmem:[#allocation3 + $0x78] sm:$0xf] %v731_v58 }
  0xbb   : > { %v682_v59 = vpop.permute.xlu0 %681 }
  0xbc   : > { %v686_v10 = vsel %vm683_vm6, %v680_v7, %v682_v59 }
  0xbd   : > { %692 = vst [vmem:[#allocation3 + $0x70] sm:$0xf] %v686_v10 }
  0xbf   : > { %v729_v60 = vpop.permute.xlu0 %728 }
  0xc0   : > { %v733_v15 = vsel %vm730_vm7, %v727_v13, %v729_v60 }
  0xc1   : > { %739 = vst [vmem:[#allocation3 + $0x88] sm:$0xf] %v733_v15 }
  0xc3   : > { %v772_v61 = vpop.permute.xlu0 %771 }
  0xc4   : > { %v779_v19 = vsel %vm777_vm8, %v772_v61, %v774_v18 }
  0xc5   : > { %785 = vst [vmem:[#allocation3 + $0x98] sm:$0xf] %v779_v19 }
  0xc7   : > { %v819_v1 = vpop.permute.xlu0 %818 }
  0xc8   : > { %v826_v23 = vsel %vm824_vm9, %v819_v1, %v821_v22 }
  0xc9   : > { %832 = vst [vmem:[#allocation3 + $0xb0] sm:$0xf] %v826_v23 }
  0xcb   : > { %v770_v6 = vpop.permute.xlu0 %769 }
  0xcc   : > { %v778_v11 = vsel %vm777_vm8, %v770_v6, %v772_v61 }
  0xcd   : > { %784 = vst [vmem:[#allocation3 + $0x90] sm:$0xf] %v778_v11 }
  0xcf   : > { %v817_v12 = vpop.permute.xlu0 %816 }
  0xd0   : > { %v825_v16 = vsel %vm824_vm9, %v817_v12, %v819_v1 }
  0xd1   : > { %831 = vst [vmem:[#allocation3 + $0xa8] sm:$0xf] %v825_v16 }
  0xd3   : > { %v776_v17 = vpop.permute.xlu0 %775 }
  0xd4   : > { %v780_v20 = vsel %vm777_vm8, %v774_v18, %v776_v17 }
  0xd5   : > { %786 = vst [vmem:[#allocation3 + $0xa0] sm:$0xf] %v780_v20 }
  0xd7   : > { %v823_v21 = vpop.permute.xlu0 %822 }
  0xd8   : > { %v827_v24 = vsel %vm824_vm9, %v821_v22, %v823_v21 }
  0xd9   : > { %833 = vst [vmem:[#allocation3 + $0xb8] sm:$0xf] %v827_v24 }
  0xdb   : > { %v2024_v26 = vpop.permute.xlu0 %865 }
  0xdc   : > { %v873_v27 = vsel %vm871_vm10, %v2024_v26, %v2022_v25 }
  0xdd   : > { %879 = vst [vmem:[#allocation3 + $0xc8] sm:$0xf] %v873_v27 }
  0xea   : > { %v499_v29 = vpop.f32.mrb[0].mxu1  ;;  %v428_v30 = vpop.f32.mrb[0].mxu0 }
  0xeb   : > { %508 = vst [vmem:[#allocation2 + $0x8] sm:$0xf] %v499_v29  ;;  %v1623_v31 = vpop.f32.mrb[1].mxu1  ;;  %v430_v32 = vpop.f32.mrb[1].mxu0  ;;  %v1758_v34 = vcombine.low %v428_v30, %v428_v30 }
  0xec   : > { %v505_v33 = vcombine.low %v428_v30, %v430_v32 }
  0xed   : > { %525 = vst [vmem:[#allocation3] sm:$0xf0] %v1758_v34 }
  0xee   : > { %526 = vst [vmem:[#allocation3 + $0x8] sm:$0xf0] %v505_v33  ;;  %607 = vrot.lane.b32.xlu0 %v505_v33, %s1773_s11 }
  0xf2   : > { %v1750_v35 = vld [vmem:[#allocation2 + $0x8] ss:$0 sps:$4 sm:$0xff]   ;;  %654 = vrot.lane.b32.xlu0 %v505_v33, %s1774_s19 }
  0xf3   : > { %v553_v37 = vld [vmem:[#allocation2 + $0x8] sm:$0xff]  ;;  %527 = vst [vmem:[#allocation3 + $0x10] sm:$0xf0] %v1750_v35 }
  0xf4   : > { %564 = vrot.lane.b32.xlu1 %v553_v37, %s1772_s10  ;;  %v557_v38 = vcombine.low %v553_v37, %v553_v37 }
  0xf6   : > { %701 = vrot.lane.b32.xlu0 %v505_v33, %s1775_s20 }
  0xf8   : > { %611 = vrot.lane.b32.xlu1 %v553_v37, %s1773_s11 }
  0xfa   : > { %748 = vrot.lane.b32.xlu0 %v505_v33, %s1776_s21  ;;  %v907_v1 = vld [vmem:[#allocation3 + $0x10] sm:$0xff] }
  0xfc   : > { %658 = vrot.lane.b32.xlu1 %v553_v37, %s1774_s19 }
  0xfe   : > { %795 = vrot.lane.b32.xlu0 %v505_v33, %s1777_s22 }
 0x100   : > { %705 = vrot.lane.b32.xlu1 %v553_v37, %s1775_s20 }
 0x102   : > { %842 = vrot.lane.b32.xlu0 %v505_v33, %s1778_s23 }
 0x104   : > { %752 = vrot.lane.b32.xlu1 %v553_v37, %s1776_s21 }
 0x106   : > { %889 = vrot.lane.b32.xlu0 %v505_v33, %s1779_s24 }
 0x108   : > { %799 = vrot.lane.b32.xlu1 %v553_v37, %s1777_s22 }
 0x10a   : > { %863 = vrot.lane.b32.xlu0 %v1917_v28, %s1779_s24  ;;  %v932_v28 = vld [vmem:[%s2207_s5] sm:$0xf] }
 0x10c   : > { %846 = vrot.lane.b32.xlu1 %v553_v37, %s1778_s23 }
 0x10e   : > { %869 = vrot.lane.b32.xlu0 %v1950_v36, %s1779_s24  ;;  %v1780_v36 = vmov 0  }
 0x10f   : > { %1747 = vset.pattern.permute.xlu0 %v1780_v36 }
 0x110   : > { %562 = vrot.lane.b32.xlu1 %v557_v38, %s1772_s10 }
 0x112   : > { %935 = vperm.xlu0 %1747, %v932_v28  }
 0x114   : > { %609 = vrot.lane.b32.xlu1 %v557_v38, %s1773_s11 }
 0x118   : > { %656 = vrot.lane.b32.xlu1 %v557_v38, %s1774_s19 }
 0x11c   : > { %703 = vrot.lane.b32.xlu1 %v557_v38, %s1775_s20 }
 0x120   : > { %750 = vrot.lane.b32.xlu1 %v557_v38, %s1776_s21 }
 0x124   : > { %797 = vrot.lane.b32.xlu1 %v557_v38, %s1777_s22 }
 0x128   : > { %844 = vrot.lane.b32.xlu1 %v557_v38, %s1778_s23 }
 0x12c   : > { %560 = vrot.lane.b32.xlu1 %v505_v33, %s1772_s10 }
 0x130   : > { %558 = vrot.lane.b32.xlu1 %v1758_v34, %s1772_s10 }
 0x134   : > { %605 = vrot.lane.b32.xlu1 %v1758_v34, %s1773_s11 }
 0x138   : > { %652 = vrot.lane.b32.xlu1 %v1758_v34, %s1774_s19 }
 0x13c   : > { %699 = vrot.lane.b32.xlu1 %v1758_v34, %s1775_s20 }
 0x140   : > { %746 = vrot.lane.b32.xlu1 %v1758_v34, %s1776_s21 }
 0x144   : > { %793 = vrot.lane.b32.xlu1 %v1758_v34, %s1777_s22 }
 0x148   : > { %840 = vrot.lane.b32.xlu1 %v1758_v34, %s1778_s23 }
 0x14c   : > { %891 = vrot.lane.b32.xlu1 %v557_v38, %s1779_s24 }
 0x150   : > { %887 = vrot.lane.b32.xlu1 %v1758_v34, %s1779_s24  ;;  %v906_v34 = vld [vmem:[#allocation3 + $0x8] sm:$0xff] }
 0x154   : > { %893 = vrot.lane.b32.xlu1 %v553_v37, %s1779_s24 }
 0x160   : > { %v2068_v39 = vpop.permute.xlu0 %607 }
 0x164   : > { %v2070_v40 = vpop.permute.xlu0 %654 }
 0x166   : > { %v565_v41 = vpop.permute.xlu1 %564 }
 0x168   : > { %v2072_v42 = vpop.permute.xlu0 %701 }
 0x16a   : > { %v612_v43 = vpop.permute.xlu1 %611 }
 0x16c   : > { %v2074_v44 = vpop.permute.xlu0 %748 }
 0x16e   : > { %v659_v45 = vpop.permute.xlu1 %658 }
 0x170   : > { %v2076_v46 = vpop.permute.xlu0 %795 }
 0x172   : > { %v706_v47 = vpop.permute.xlu1 %705 }
 0x174   : > { %v2078_v48 = vpop.permute.xlu0 %842 }
 0x176   : > { %v753_v49 = vpop.permute.xlu1 %752 }
 0x178   : > { %v2080_v50 = vpop.permute.xlu0 %889 }
 0x17a   : > { %v800_v51 = vpop.permute.xlu1 %799 }
 0x17c   : > { %v864_v52 = vpop.permute.xlu0 %863 }
 0x17d   : > { %v872_v54 = vsel %vm871_vm10, %v864_v52, %v2024_v26 }
 0x17e   : > { %v847_v53 = vpop.permute.xlu1 %846  ;;  %878 = vst [vmem:[#allocation3 + $0xc0] sm:$0xf] %v872_v54 }
 0x180   : > { %v870_v55 = vpop.permute.xlu0 %869 }
 0x181   : > { %v874_v57 = vsel %vm871_vm10, %v2022_v25, %v870_v55 }
 0x182   : > { %v563_v56 = vpop.permute.xlu1 %562  ;;  %880 = vst [vmem:[#allocation3 + $0xd0] sm:$0xf] %v874_v57 }
 0x183   : > { %v568_v58 = vsel %vm542_vm3, %v563_v56, %v565_v41  ;;  %v905_v41 = vld [vmem:[#allocation3] sm:$0xff] }
 0x184   : > { %574 = vst [vmem:[#allocation3 + $0x28] sm:$0xf0] %v568_v58 }
 0x186   : > { %v610_v59 = vpop.permute.xlu1 %609 }
 0x187   : > { %v614_v60 = vsel %vm589_vm4, %v2068_v39, %v610_v59  ;;  %v615_v61 = vsel %vm589_vm4, %v610_v59, %v612_v43 }
 0x188   : > { %620 = vst [vmem:[#allocation3 + $0x38] sm:$0xf0] %v614_v60  ;;  %621 = vst [vmem:[#allocation3 + $0x40] sm:$0xf0] %v615_v61 }
 0x18a   : > { %v657_v62 = vpop.permute.xlu1 %656 }
 0x18b   : > { %v661_v63 = vsel %vm636_vm5, %v2070_v40, %v657_v62  ;;  %v662_v0 = vsel %vm636_vm5, %v657_v62, %v659_v45  ;;  %v910_v2 = vld [vmem:[#allocation3 + $0x28] sm:$0xff] }
 0x18c   : > { %667 = vst [vmem:[#allocation3 + $0x50] sm:$0xf0] %v661_v63  ;;  %668 = vst [vmem:[#allocation3 + $0x58] sm:$0xf0] %v662_v0  ;;  %v1696_v4 = vpack.c.bf16 %v910_v2, %v907_v1 }
 0x18e   : > { %v704_v5 = vpop.permute.xlu1 %703  ;;  %1697 = vmatpush3.bf16.msra.mxu1 %v1696_v4 }
 0x18f   : > { %v708_v6 = vsel %vm683_vm6, %v2072_v42, %v704_v5  ;;  %v709_v7 = vsel %vm683_vm6, %v704_v5, %v706_v47  ;;  %1698 = vmatprep.subr.bf16.mxu1 %v1769_v3  ;;  %v913_v12 = vld [vmem:[#allocation3 + $0x40] sm:$0xff]  ;;  %v912_v47 = vld [vmem:[#allocation3 + $0x38] sm:$0xff] }
 0x190   : > { %714 = vst [vmem:[#allocation3 + $0x68] sm:$0xf0] %v708_v6  ;;  %715 = vst [vmem:[#allocation3 + $0x70] sm:$0xf0] %v709_v7 }
 0x192   : > { %v751_v9 = vpop.permute.xlu1 %750 }
 0x193   : > { %v755_v10 = vsel %vm730_vm7, %v2074_v44, %v751_v9  ;;  %v756_v11 = vsel %vm730_vm7, %v751_v9, %v753_v49  ;;  %v916_v13 = vld [vmem:[#allocation3 + $0x58] sm:$0xff]  ;;  %v915_v28 = vld [vmem:[#allocation3 + $0x50] sm:$0xff] }
 0x194   : > { %761 = vst [vmem:[#allocation3 + $0x80] sm:$0xf0] %v755_v10  ;;  %762 = vst [vmem:[#allocation3 + $0x88] sm:$0xf0] %v756_v11  ;;  %v1699_v14 = vpack.c.bf16 %v916_v13, %v913_v12  ;;  %v1683_v49 = vpack.c.bf16 %v915_v28, %v912_v47  ;;  %v904_v13 = vld [vmem:[%s2206_s4] sm:$0xf] }
 0x196   : > { %v798_v15 = vpop.permute.xlu1 %797  ;;  %1700 = vmatpush3.bf16.msra.mxu1 %v1699_v14 }
 0x197   : > { %v802_v16 = vsel %vm777_vm8, %v2076_v46, %v798_v15  ;;  %v803_v17 = vsel %vm777_vm8, %v798_v15, %v800_v51  ;;  %1701 = vmatprep.subr.bf16.mxu1 %v1769_v3  ;;  %v919_v21 = vld [vmem:[#allocation3 + $0x70] sm:$0xff]  ;;  %v918_v57 = vld [vmem:[#allocation3 + $0x68] sm:$0xff]  ;;  %v1088_v15 = vlaneseq }
 0x198   : > { %808 = vst [vmem:[#allocation3 + $0x98] sm:$0xf0] %v802_v16  ;;  %809 = vst [vmem:[#allocation3 + $0xa0] sm:$0xf0] %v803_v17 }
 0x199   : > { %v1089_v16 = vshrl.u32 %v1088_v15, 7 }
 0x19a   : > { %v845_v18 = vpop.permute.xlu1 %844 }
 0x19b   : > { %v849_v19 = vsel %vm824_vm9, %v2078_v48, %v845_v18  ;;  %v850_v20 = vsel %vm824_vm9, %v845_v18, %v847_v53  ;;  %v922_v22 = vld [vmem:[#allocation3 + $0x88] sm:$0xff]  ;;  %v921_v53 = vld [vmem:[#allocation3 + $0x80] sm:$0xff]  ;;  %v1090_v17 = vsub.s32 0, %v1089_v16  ;;  %v1086_v18 = vld [vmem:[%s2202_s0] sm:$0x7] }
 0x19c   : > { %855 = vst [vmem:[#allocation3 + $0xb0] sm:$0xf0] %v849_v19  ;;  %856 = vst [vmem:[#allocation3 + $0xb8] sm:$0xf0] %v850_v20  ;;  %v1702_v23 = vpack.c.bf16 %v922_v22, %v919_v21  ;;  %v1687_v58 = vpack.c.bf16 %v921_v53, %v918_v57  ;;  %v936_v19 = vpop.permute.xlu0 %935  ;;  %v1094_v20 = vsub.s32 1, %v1089_v16 }
 0x19d   : > { %v1091_v22 = vrot.slane %v1086_v18, %v1090_v17 }
 0x19e   : > { %1703 = vmatpush3.bf16.msra.mxu1 %v1702_v23  ;;  %v561_v24 = vpop.permute.xlu1 %560 }
 0x19f   : > { %v567_v25 = vsel %vm542_vm3, %v561_v24, %v563_v56  ;;  %1704 = vmatprep.subr.bf16.mxu1 %v1769_v3  ;;  %v925_v29 = vld [vmem:[#allocation3 + $0xa0] sm:$0xff]  ;;  %v924_v1 = vld [vmem:[#allocation3 + $0x98] sm:$0xff] }
 0x1a0   : > { %573 = vst [vmem:[#allocation3 + $0x20] sm:$0xf0] %v567_v25  ;;  %v1098_v25 = vsub.s32 2, %v1089_v16 }
 0x1a2   : > { %v559_v26 = vpop.permute.xlu1 %558 }
 0x1a3   : > { %v566_v27 = vsel %vm542_vm3, %v559_v26, %v561_v24  ;;  %v928_v30 = vld [vmem:[#allocation3 + $0xb8] sm:$0xff]  ;;  %v927_v61 = vld [vmem:[#allocation3 + $0xb0] sm:$0xff] }
 0x1a4   : > { %572 = vst [vmem:[#allocation3 + $0x18] sm:$0xf0] %v566_v27  ;;  %v1705_v31 = vpack.c.bf16 %v928_v30, %v925_v29  ;;  %v1691_v2 = vpack.c.bf16 %v927_v61, %v924_v1  ;;  %v1095_v27 = vrot.slane %v1086_v18, %v1094_v20 }
 0x1a6   : > { %1706 = vmatpush3.bf16.msra.mxu1 %v1705_v31  ;;  %v606_v32 = vpop.permute.xlu1 %605 }
 0x1a7   : > { %v613_v33 = vsel %vm589_vm4, %v606_v32, %v2068_v39  ;;  %v909_v35 = vld [vmem:[#allocation3 + $0x20] sm:$0xff]  ;;  %1640 = vmatprep.subr.mxu1 %v1770_v8 }
 0x1a8   : > { %619 = vst [vmem:[#allocation3 + $0x30] sm:$0xf0] %v613_v33  ;;  %v1679_v37 = vpack.c.bf16 %v909_v35, %v906_v34  ;;  %v1099_v34 = vrot.slane %v1086_v18, %v1098_v25 }
 0x1aa   : > { %v653_v38 = vpop.permute.xlu1 %652  ;;  %1680 = vmatprep.subr.bf16.mxu0 %v1679_v37 }
 0x1ab   : > { %v660_v36 = vsel %vm636_vm5, %v653_v38, %v2070_v40  ;;  %v908_v43 = vld [vmem:[#allocation3 + $0x18] sm:$0xff] }
 0x1ac   : > { %666 = vst [vmem:[#allocation3 + $0x48] sm:$0xf0] %v660_v36  ;;  %v1681_v45 = vpack.c.bf16 %v908_v43, %v905_v41 }
 0x1ae   : > { %v700_v51 = vpop.permute.xlu1 %699  ;;  %1682 = vmatpush1.bf16.msra.mxu0 %v1681_v45 }
 0x1af   : > { %v707_v39 = vsel %vm683_vm6, %v700_v51, %v2072_v42  ;;  %1684 = vmatprep.subr.bf16.mxu0 %v1683_v49  ;;  %v911_v55 = vld [vmem:[#allocation3 + $0x30] sm:$0xff] }
 0x1b0   : > { %713 = vst [vmem:[#allocation3 + $0x60] sm:$0xf0] %v707_v39 }
 0x1b2   : > { %v747_v52 = vpop.permute.xlu1 %746 }
 0x1b3   : > { %v754_v54 = vsel %vm730_vm7, %v747_v52, %v2074_v44  ;;  %v914_v40 = vld [vmem:[#allocation3 + $0x48] sm:$0xff] }
 0x1b4   : > { %760 = vst [vmem:[#allocation3 + $0x78] sm:$0xf0] %v754_v54  ;;  %v1685_v56 = vpack.c.bf16 %v914_v40, %v911_v55 }
 0x1b6   : > { %v794_v59 = vpop.permute.xlu1 %793  ;;  %1686 = vmatpush1.bf16.msra.mxu0 %v1685_v56  ;;  %v1325_v56 = vld [vmem:[%s2209_s7] sm:$0xff] }
 0x1b7   : > { %v801_v60 = vsel %vm777_vm8, %v794_v59, %v2076_v46  ;;  %1688 = vmatprep.subr.bf16.mxu0 %v1687_v58  ;;  %v917_v63 = vld [vmem:[#allocation3 + $0x60] sm:$0xff] }
 0x1b8   : > { %807 = vst [vmem:[#allocation3 + $0x90] sm:$0xf0] %v801_v60 }
 0x1ba   : > { %v841_v42 = vpop.permute.xlu1 %840 }
 0x1bb   : > { %v848_v62 = vsel %vm824_vm9, %v841_v42, %v2078_v48  ;;  %v920_v44 = vld [vmem:[#allocation3 + $0x78] sm:$0xff] }
 0x1bc   : > { %854 = vst [vmem:[#allocation3 + $0xa8] sm:$0xf0] %v848_v62  ;;  %v1689_v0 = vpack.c.bf16 %v920_v44, %v917_v63 }
 0x1be   : > { %v892_v4 = vpop.permute.xlu1 %891  ;;  %1690 = vmatpush1.bf16.msra.mxu0 %v1689_v0 }
 0x1bf   : > { %v896_v5 = vsel %vm871_vm10, %v2080_v50, %v892_v4  ;;  %1692 = vmatprep.subr.bf16.mxu0 %v1691_v2  ;;  %v923_v7 = vld [vmem:[#allocation3 + $0x90] sm:$0xff] }
 0x1c0   : > { %902 = vst [vmem:[#allocation3 + $0xc8] sm:$0xf0] %v896_v5 }
 0x1c2   : > { %v888_v46 = vpop.permute.xlu1 %887 }
 0x1c3   : > { %v895_v6 = vsel %vm871_vm10, %v888_v46, %v2080_v50  ;;  %v926_v9 = vld [vmem:[#allocation3 + $0xa8] sm:$0xff] }
 0x1c4   : > { %901 = vst [vmem:[#allocation3 + $0xc0] sm:$0xf0] %v895_v6  ;;  %v1693_v48 = vpack.c.bf16 %v926_v9, %v923_v7 }
 0x1c6   : > { %v894_v10 = vpop.permute.xlu1 %893  ;;  %1694 = vmatpush1.bf16.msra.mxu0 %v1693_v48 }
 0x1c7   : > { %v897_v11 = vsel %vm871_vm10, %v892_v4, %v894_v10  ;;  %v930_v12 = vld [vmem:[#allocation3 + $0xc8] sm:$0xff] }
 0x1c8   : > { %903 = vst [vmem:[#allocation3 + $0xd0] sm:$0xf0] %v897_v11  ;;  %958 = vmatprep.subr.mxu0 %v930_v12 }
 0x1cb   : > { %v929_v14 = vld [vmem:[#allocation3 + $0xc0] sm:$0xff] }
 0x1cc   : > { %959 = vmatpush1.msra.mxu0 %v929_v14 }
 0x1cd   : > { %1573 = vmatmul.mubr.msk.f32.vlgmr.msra.gmra.mrb[2].mxu0 %vm938_vm11, %v904_v13 }
 0x1ce   : > { %1409 = vmatprep.mubr.f32.mxu0 %v1770_v8 }
 0x1cf   : > { %v931_v50 = vld [vmem:[#allocation3 + $0xd0] sm:$0xff] }
 0x1d0   : > { %1641 = vmatpush3.msra.mxu1 %v931_v50 }
 0x1d1   : > { %1643 = vmatmul.mubr.msk.f32.vlgmr.msra.gmra.mrb[2].mxu1 %vm938_vm11, %v904_v13  ;;  %1715 = vmatprep.subr.bf16.mxu1 %v1769_v3 }
 0x1d2   : > { %1655 = vmatprep.mubr.msk.f32.mxu1 %vm1771_vm0, %v1770_v8  ;;  %vm1198_vm0 = vcmask 7168  }
 0x2a0   : > { %v1008_v21 = vpop.f32.mrb[2].mxu0 }
 0x2a1   : > { %v1009_v23 = vadd.f32 %v1008_v21, %v936_v19  ;;  %v1010_v24 = vpop.f32.mrb[3].mxu0 }
 0x2a2   : > { %v1011_v26 = vadd.f32 %v1010_v24, %v936_v19 }
 0x2a3   : > { %v1083_v29 = vmax.f32 %v1009_v23, 0.0 }
 0x2a4   : > { %v1084_v30 = vmax.f32 %v1011_v26, 0.0  ;;  %v1079_v31 = vpop.f32.mrb[2].mxu1 }
 0x2a5   : > { %v1103_v32 = vmul.f32 %v1091_v22, %v1083_v29  ;;  %v1080_v33 = vadd.f32 %v1079_v31, %v936_v19  ;;  %v1644_v35 = vpop.f32.mrb[3].mxu1 }
 0x2a6   : > { %v1104_v37 = vmul.f32 %v1095_v27, %v1084_v30 }
 0x2a7   : > { %v1085_v38 = vmax.f32 %v1080_v33, 0.0  ;;  %v1760_v55 = vcombine.low %v1103_v32, %v1103_v32 }
 0x2a8   : > { %v1108_v28 = vcombine.low %v1103_v32, %v1104_v37  ;;  %v1759_v41 = vcombine.low %v1104_v37, %v1104_v37 }
 0x2a9   : > { %v1105_v36 = vmul.f32 %v1099_v34, %v1085_v38 }
 0x2aa   : > { %1110 = vst [vmem:[#allocation4 + $0x4] sm:$0xff] %v1108_v28  ;;  %1213 = vst [vmem:[#allocation5 + $0x30] sm:$0xf] %v1108_v28 }
 0x2ab   : > { %1111 = vst [vmem:[#allocation4 + $0xc] sm:$0xf] %v1105_v36  ;;  %1214 = vst [vmem:[#allocation5 + $0x38] sm:$0xf] %v1759_v41 }
 0x2b1   : > { %v1136_v49 = vld [vmem:[#allocation4] sm:$0xff] }
 0x2b2   : > { %v1209_v43 = vld [vmem:[#allocation4 + $0xc] sm:$0xf]  ;;  %v1116_v52 = vcombine.high %v1136_v49, %v1136_v49  ;;  %v1140_v40 = vcombine.low %v1136_v49, %v1136_v49 }
 0x2b3   : > { %v1240_v45 = vld [vmem:[#allocation4 + $0xc] sm:$0xff]  ;;  %1215 = vst [vmem:[#allocation5 + $0x40] sm:$0xf] %v1209_v43 }
 0x2b4   : > { %1249 = vrot.lane.b32.xlu1 %v1240_v45, %s1781_s12  ;;  %v1244_v47 = vcombine.high %v1240_v45, %v1240_v45  ;;  %v1221_v51 = vcombine.low %v1240_v45, %v1240_v45  ;;  %v1113_v39 = vld [vmem:[#allocation4 + $0x8] sm:$0xff] }
 0x2b5   : > { %v1117_v53 = vcombine.high %v1113_v39, %v1113_v39  ;;  %v1141_v54 = vcombine.low %v1113_v39, %v1113_v39 }
 0x2b6   : > { %1251 = vrot.lane.b32.xlu0 %v1244_v47, %s1781_s12 }
 0x2b8   : > { %1228 = vrot.lane.b32.xlu1 %v1240_v45, %s1772_s10 }
 0x2ba   : > { %1144 = vrot.lane.b32.xlu0 %v1136_v49, %s1782_s13 }
 0x2bc   : > { %1226 = vrot.lane.b32.xlu1 %v1221_v51, %s1772_s10 }
 0x2be   : > { %1192 = vrot.lane.b32.xlu0 %v1136_v49, %s1783_s14 }
 0x2c0   : > { %1273 = vrot.lane.b32.xlu1 %v1221_v51, %s1774_s19 }
 0x2c2   : > { %1118 = vrot.lane.b32.xlu0 %v1136_v49, %s1784_s15 }
 0x2c4   : > { %1122 = vrot.lane.b32.xlu1 %v1113_v39, %s1784_s15 }
 0x2c6   : > { %1166 = vrot.lane.b32.xlu0 %v1136_v49, %s1785_s16 }
 0x2c8   : > { %1170 = vrot.lane.b32.xlu1 %v1113_v39, %s1785_s16 }
 0x2ca   : > { %1224 = vrot.lane.b32.xlu0 %v1108_v28, %s1772_s10 }
 0x2cc   : > { %1148 = vrot.lane.b32.xlu1 %v1113_v39, %s1782_s13 }
 0x2ce   : > { %1271 = vrot.lane.b32.xlu0 %v1108_v28, %s1774_s19 }
 0x2d0   : > { %1196 = vrot.lane.b32.xlu1 %v1113_v39, %s1783_s14 }
 0x2d2   : > { %1168 = vrot.lane.b32.xlu0 %v1116_v52, %s1785_s16 }
 0x2d4   : > { %1245 = vrot.lane.b32.xlu1 %v1108_v28, %s1781_s12 }
 0x2d6   : > { %1124 = vrot.lane.b32.xlu0 %v1117_v53, %s1784_s15 }
 0x2d8   : > { %1120 = vrot.lane.b32.xlu1 %v1116_v52, %s1784_s15 }
 0x2da   : > { %1172 = vrot.lane.b32.xlu0 %v1117_v53, %s1785_s16 }
 0x2dc   : > { %1146 = vrot.lane.b32.xlu1 %v1141_v54, %s1782_s13 }
 0x2de   : > { %1247 = vrot.lane.b32.xlu0 %v1759_v41, %s1781_s12 }
 0x2e0   : > { %1194 = vrot.lane.b32.xlu1 %v1141_v54, %s1783_s14 }
 0x2e2   : > { %1222 = vrot.lane.b32.xlu0 %v1760_v55, %s1772_s10 }
 0x2e4   : > { %1142 = vrot.lane.b32.xlu1 %v1140_v40, %s1782_s13 }
 0x2e6   : > { %1269 = vrot.lane.b32.xlu0 %v1760_v55, %s1774_s19 }
 0x2e8   : > { %1190 = vrot.lane.b32.xlu1 %v1140_v40, %s1783_s14 }
 0x2ea   : > { %1294 = vrot.lane.b32.xlu0 %v1759_v41, %s1775_s20 }
 0x2ec   : > { %1275 = vrot.lane.b32.xlu1 %v1240_v45, %s1774_s19 }
 0x2ee   : > { %1292 = vrot.lane.b32.xlu0 %v1108_v28, %s1775_s20 }
 0x2f0   : > { %1296 = vrot.lane.b32.xlu1 %v1240_v45, %s1775_s20 }
 0x2f2   : > { %1328 = vperm.xlu0 %1747, %v1325_v56  }
 0x2f4   : > { %1298 = vrot.lane.b32.xlu1 %v1244_v47, %s1775_s20  ;;  %s1721_s20 = smul.u32 24, %s2212_s28 }
 0x2f6   : > { %s322_s23 = scalar_lea.vmem %s2210_s8, %s1721_s20 }
 0x326   : > { %v1250_v57 = vpop.permute.xlu1 %1249 }
 0x328   : > { %v1252_v58 = vpop.permute.xlu0 %1251 }
 0x329   : > { %v1256_v59 = vsel %vm1253_vm12, %v1250_v57, %v1252_v58 }
 0x32a   : > { %1262 = vst [vmem:[#allocation5 + $0x58] sm:$0xf] %v1256_v59  ;;  %v1229_v60 = vpop.permute.xlu1 %1228 }
 0x32c   : > { %v1145_v42 = vpop.permute.xlu0 %1144 }
 0x32e   : > { %v1227_v61 = vpop.permute.xlu1 %1226 }
 0x32f   : > { %v1232_v62 = vsel %vm542_vm3, %v1227_v61, %v1229_v60 }
 0x330   : > { %1238 = vst [vmem:[#allocation5 + $0x40] sm:$0xf0] %v1232_v62  ;;  %v1193_v63 = vpop.permute.xlu0 %1192 }
 0x332   : > { %v2167_v44 = vpop.permute.xlu1 %1273 }
 0x334   : > { %v1119_v0 = vpop.permute.xlu0 %1118 }
 0x336   : > { %v1123_v1 = vpop.permute.xlu1 %1122 }
 0x338   : > { %v1167_v2 = vpop.permute.xlu0 %1166 }
 0x33a   : > { %v1171_v4 = vpop.permute.xlu1 %1170 }
 0x33c   : > { %v1225_v5 = vpop.permute.xlu0 %1224 }
 0x33d   : > { %v1231_v46 = vsel %vm542_vm3, %v1225_v5, %v1227_v61 }
 0x33e   : > { %1237 = vst [vmem:[#allocation5 + $0x38] sm:$0xf0] %v1231_v46  ;;  %v1149_v6 = vpop.permute.xlu1 %1148 }
 0x340   : > { %v1272_v7 = vpop.permute.xlu0 %1271 }
 0x341   : > { %v1278_v9 = vsel %vm636_vm5, %v1272_v7, %v2167_v44 }
 0x342   : > { %1284 = vst [vmem:[#allocation5 + $0x50] sm:$0xf0] %v1278_v9  ;;  %v1197_v48 = vpop.permute.xlu1 %1196 }
 0x344   : > { %v1169_v10 = vpop.permute.xlu0 %1168 }
 0x345   : > { %v1175_v11 = vsel %vm1174_vm13, %v1167_v2, %v1169_v10  ;;  %v1176_v12 = vsel %vm1174_vm13, %v1169_v10, %v1171_v4  ;;  %v1317_v59 = vld [vmem:[#allocation5 + $0x38] sm:$0xff] }
 0x346   : > { %1181 = vst [vmem:[#allocation5 + $0x18] sm:$0xf] %v1175_v11  ;;  %1182 = vst [vmem:[#allocation5 + $0x20] sm:$0xf] %v1176_v12  ;;  %v1246_v13 = vpop.permute.xlu1 %1245 }
 0x348   : > { %v1125_v14 = vpop.permute.xlu0 %1124 }
 0x349   : > { %v1129_v50 = vsel %vm1126_vm14, %v1123_v1, %v1125_v14 }
 0x34a   : > { %1135 = vst [vmem:[#allocation5 + $0x10] sm:$0xf] %v1129_v50  ;;  %v1121_v15 = vpop.permute.xlu1 %1120 }
 0x34b   : > { %v1127_v16 = vsel %vm1126_vm14, %v1119_v0, %v1121_v15  ;;  %v1128_v17 = vsel %vm1126_vm14, %v1121_v15, %v1123_v1 }
 0x34c   : > { %1133 = vst [vmem:[#allocation5] sm:$0xf] %v1127_v16  ;;  %1134 = vst [vmem:[#allocation5 + $0x8] sm:$0xf] %v1128_v17  ;;  %v1173_v18 = vpop.permute.xlu0 %1172 }
 0x34d   : > { %v1177_v19 = vsel %vm1174_vm13, %v1171_v4, %v1173_v18  ;;  %v1309_v4 = vld [vmem:[%s2208_s6] sm:$0xff] }
 0x34e   : > { %1183 = vst [vmem:[#allocation5 + $0x28] sm:$0xf] %v1177_v19  ;;  %v1147_v20 = vpop.permute.xlu1 %1146 }
 0x34f   : > { %v1152_v21 = vsel %vm1150_vm15, %v1145_v42, %v1147_v20  ;;  %v1153_v22 = vsel %vm1150_vm15, %v1147_v20, %v1149_v6 }
 0x350   : > { %1158 = vst [vmem:[#allocation5 + $0x8] sm:$0xf0] %v1152_v21  ;;  %1159 = vst [vmem:[#allocation5 + $0x10] sm:$0xf0] %v1153_v22  ;;  %v1248_v23 = vpop.permute.xlu0 %1247 }
 0x351   : > { %v1254_v24 = vsel %vm1253_vm12, %v1246_v13, %v1248_v23  ;;  %v1255_v25 = vsel %vm1253_vm12, %v1248_v23, %v1250_v57 }
 0x352   : > { %1260 = vst [vmem:[#allocation5 + $0x48] sm:$0xf] %v1254_v24  ;;  %1261 = vst [vmem:[#allocation5 + $0x50] sm:$0xf] %v1255_v25  ;;  %v1195_v26 = vpop.permute.xlu1 %1194 }
 0x353   : > { %v1200_v27 = vsel %vm1198_vm0, %v1193_v63, %v1195_v26  ;;  %v1201_v29 = vsel %vm1198_vm0, %v1195_v26, %v1197_v48 }
 0x354   : > { %1206 = vst [vmem:[#allocation5 + $0x20] sm:$0xf0] %v1200_v27  ;;  %1207 = vst [vmem:[#allocation5 + $0x28] sm:$0xf0] %v1201_v29  ;;  %v1223_v30 = vpop.permute.xlu0 %1222 }
 0x355   : > { %v1230_v31 = vsel %vm542_vm3, %v1223_v30, %v1225_v5 }
 0x356   : > { %1236 = vst [vmem:[#allocation5 + $0x30] sm:$0xf0] %v1230_v31  ;;  %v1143_v32 = vpop.permute.xlu1 %1142 }
 0x357   : > { %v1151_v33 = vsel %vm1150_vm15, %v1143_v32, %v1145_v42  ;;  %v1311_v38 = vld [vmem:[#allocation5 + $0x8] sm:$0xff]  ;;  %v1312_v41 = vld [vmem:[#allocation5 + $0x10] sm:$0xff] }
 0x358   : > { %1157 = vst [vmem:[#allocation5] sm:$0xf0] %v1151_v33  ;;  %v1270_v34 = vpop.permute.xlu0 %1269 }
 0x359   : > { %v1277_v35 = vsel %vm636_vm5, %v1270_v34, %v1272_v7  ;;  %v1320_v55 = vld [vmem:[#allocation5 + $0x50] sm:$0xff] }
 0x35a   : > { %1283 = vst [vmem:[#allocation5 + $0x48] sm:$0xf0] %v1277_v35  ;;  %v1191_v37 = vpop.permute.xlu1 %1190  ;;  %v1711_v60 = vpack.c.bf16 %v1320_v55, %v1317_v59 }
 0x35b   : > { %v1199_v28 = vsel %vm1198_vm0, %v1191_v37, %v1193_v63  ;;  %v1314_v36 = vld [vmem:[#allocation5 + $0x20] sm:$0xff]  ;;  %v1315_v43 = vld [vmem:[#allocation5 + $0x28] sm:$0xff] }
 0x35c   : > { %1205 = vst [vmem:[#allocation5 + $0x18] sm:$0xf0] %v1199_v28  ;;  %v1295_v45 = vpop.permute.xlu0 %1294  ;;  %v1707_v47 = vpack.c.bf16 %v1314_v36, %v1311_v38  ;;  %v1716_v49 = vpack.c.bf16 %v1315_v43, %v1312_v41  ;;  %v1318_v63 = vld [vmem:[#allocation5 + $0x40] sm:$0xff] }
 0x35d   : > { %v1316_v62 = vld [vmem:[#allocation5 + $0x30] sm:$0xff] }
 0x35e   : > { %1708 = vmatprep.subr.bf16.mxu0 %v1707_v47  ;;  %1717 = vmatpush3.bf16.msra.mxu1 %v1716_v49  ;;  %v1276_v51 = vpop.permute.xlu1 %1275 }
 0x35f   : > { %v1279_v39 = vsel %vm636_vm5, %v2167_v44, %v1276_v51  ;;  %1718 = vmatprep.subr.bf16.mxu1 %v1769_v3  ;;  %v1310_v56 = vld [vmem:[#allocation5] sm:$0xff] }
 0x360   : > { %1285 = vst [vmem:[#allocation5 + $0x58] sm:$0xf0] %v1279_v39  ;;  %v1293_v52 = vpop.permute.xlu0 %1292 }
 0x361   : > { %v1300_v53 = vsel %vm683_vm6, %v1293_v52, %v1295_v45  ;;  %v1319_v42 = vld [vmem:[#allocation5 + $0x48] sm:$0xff] }
 0x362   : > { %1306 = vst [vmem:[#allocation5 + $0x60] sm:$0xf] %v1300_v53  ;;  %v1297_v54 = vpop.permute.xlu1 %1296  ;;  %v1713_v0 = vpack.c.bf16 %v1319_v42, %v1316_v62 }
 0x363   : > { %v1301_v40 = vsel %vm683_vm6, %v1295_v45, %v1297_v54  ;;  %v1313_v57 = vld [vmem:[#allocation5 + $0x18] sm:$0xff] }
 0x364   : > { %1307 = vst [vmem:[#allocation5 + $0x68] sm:$0xf] %v1301_v40  ;;  %v1709_v58 = vpack.c.bf16 %v1313_v57, %v1310_v56 }
 0x366   : > { %1710 = vmatpush1.bf16.msra.mxu0 %v1709_v58  ;;  %v1299_v61 = vpop.permute.xlu1 %1298 }
 0x367   : > { %v1302_v3 = vsel %vm683_vm6, %v1297_v54, %v1299_v61  ;;  %1712 = vmatprep.subr.bf16.mxu0 %v1711_v60  ;;  %v1321_v44 = vld [vmem:[#allocation5 + $0x58] sm:$0xff] }
 0x368   : > { %1308 = vst [vmem:[#allocation5 + $0x70] sm:$0xf] %v1302_v3  ;;  %v1719_v1 = vpack.c.bf16 %v1321_v44, %v1318_v63 }
 0x369   : > { %v1322_v5 = vld [vmem:[#allocation5 + $0x60] sm:$0xf] }
 0x36a   : > { %1714 = vmatpush1.bf16.msra.mxu0 %v1713_v0  ;;  %1720 = vmatpush3.bf16.msra.mxu1 %v1719_v1 }
 0x36b   : > { %v1323_v2 = vld [vmem:[#allocation5 + $0x68] sm:$0xf]  ;;  %1653 = vmatprep.subr.mxu1 %v1770_v8 }
 0x36c   : > { %1575 = vmatprep.subr.msk.mxu0 %vm1335_vm1, %v1323_v2 }
 0x36e   : > { %1576 = vmatpush1.msk.msra.mxu0 %vm1335_vm1, %v1322_v5 }
 0x36f   : > { %1577 = vmatmul.mubr.msk.f32.vlgmr.msra.gmra.mrb[4].mxu0 %vm1331_vm2, %v1309_v4  ;;  %v1324_v46 = vld [vmem:[#allocation5 + $0x70] sm:$0xf] }
 0x370   : > { %1654 = vmatpush3.msk.msra.mxu1 %vm1335_vm1, %v1324_v46 }
 0x371   : > { %1656 = vmatmul.mubr.msk.f32.vlgmr.msra.gmra.mrb[4].mxu1 %vm1331_vm2, %v1309_v4  ;;  %v1329_v6 = vpop.permute.xlu0 %1328 }
 0x442   : > { %v1411_v7 = vpop.f32.mrb[4].mxu0 }
 0x443   : > { %v1412_v9 = vadd.f32 %v1411_v7, %v1329_v6  ;;  %v1413_v48 = vpop.f32.mrb[5].mxu0 }
 0x444   : > { %v1414_v8 = vadd.f32 %v1413_v48, %v1329_v6  ;;  %v1482_v10 = vpop.f32.mrb[4].mxu1 }
 0x445   : > { %v1486_v11 = vmax.f32 %v1412_v9, 0.0  ;;  %v1483_v12 = vadd.f32 %v1482_v10, %v1329_v6  ;;  %v1657_v13 = vpop.f32.mrb[5].mxu1 }
 0x446   : > { %v1487_v14 = vmax.f32 %v1414_v8, 0.0 }
 0x447   : > { %1489 = vst [vmem:[%s322_s23] sm:$0xff] %v1486_v11  ;;  %v1488_v50 = vmax.f32 %v1483_v12, 0.0 }
 0x448   : > { %1490 = vst [vmem:[%s322_s23 + $0x8] sm:$0xff] %v1487_v14 }
 0x449   : > { %1491 = vst [vmem:[%s322_s23 + $0x10] sm:$0xff] %v1488_v50 }
 0x44a PF: > { %s18_s27 = sadd.s32 1, %s1767_s27  }
 0x44b   : > { %p15_p4 = scmp.ge.s32.totalorder %s18_s27, 4  }
 0x44d   :  { %17 = sbr.rel (!%p15_p4) target bundleno = 1 (0x1), region = 85 }

</bundles_post_ra>
